<compile_context>
chip_gen: v7x
topology: tpu7x:2x2x1
jax: 0.10.0
libtpu: 0.0.40
codegen_flags: <defaults>
</compile_context>

<pallas_src>
import functools

import jax
import jax.numpy as jnp
from jax import lax
from jax.experimental import pallas as pl
from jax.experimental.pallas import tpu as pltpu


def _layernorm(x, gamma, beta, eps=1e-5):
    # Two-pass stats (subtract mean before squaring): no catastrophic cancellation.
    mean = jnp.mean(x, axis=-1, keepdims=True)
    xc = x - mean
    var = jnp.mean(xc * xc, axis=-1, keepdims=True)
    return xc * lax.rsqrt(var + eps) * gamma + beta


def block_kernel(x_ref,
                 ln1g_ref, ln1b_ref,
                 wqkv_ref,
                 wp_ref, bp_ref,
                 ln2g_ref, ln2b_ref,
                 w1_ref, b1_ref, w2_ref, b2_ref,
                 out_ref,
                 *, n_head, head_size):
    bb, T, C = x_ref.shape
    R = bb * T
    x = x_ref[...].reshape(R, C)                                  # (R, C) f32

    # ---------------- LayerNorm 1 ----------------
    xn = _layernorm(x, ln1g_ref[...], ln1b_ref[...])
    xn_b = xn.astype(jnp.bfloat16)

    # ---------------- Fused QKV projection (bf16 in, f32 acc) ----------------
    qkv = jnp.dot(xn_b, wqkv_ref[...], preferred_element_type=jnp.float32)   # (R, 3C)
    scale = C ** (-0.5)        # PyTorch Head scales by n_embd**-0.5 (intentional)
    q_b = (qkv[:, :C] * scale).astype(jnp.bfloat16)               # fold scale into q
    k_b = qkv[:, C:2 * C].astype(jnp.bfloat16)
    v_b = qkv[:, 2 * C:].astype(jnp.bfloat16)

    # ---------------- Attention: all (batch, head) pairs in one batched contraction ----
    def to_heads(a):   # (R, C) -> (bb*H, T, hs)
        return a.reshape(bb, T, n_head, head_size).swapaxes(1, 2).reshape(
            bb * n_head, T, head_size)

    qh, kh, vh = to_heads(q_b), to_heads(k_b), to_heads(v_b)
    # TODO(synk): for T >= ~512 tile over the KV axis with an online (flash-style)
    # softmax so the (bb*H, T, T) score tensor never fully materializes (critical on
    # v7x's 64 MiB VMEM).
    s = jnp.einsum('ntd,nsd->nts', qh, kh,
                   preferred_element_type=jnp.float32)            # (N, T, T) f32
    s = s - jnp.max(s, axis=-1, keepdims=True)
    p = jnp.exp(s)
    p = p * pl.reciprocal(jnp.sum(p, axis=-1, keepdims=True), approx=True)
    o = jnp.einsum('nts,nsd->ntd', p.astype(jnp.bfloat16), vh,
                   preferred_element_type=jnp.float32)            # (N, T, hs) f32
    cat = o.reshape(bb, n_head, T, head_size).swapaxes(1, 2).reshape(R, C)

    # ---------------- Output projection + residual 1 ----------------
    sa = jnp.dot(cat.astype(jnp.bfloat16), wp_ref[...],
                 preferred_element_type=jnp.float32) + bp_ref[...]
    x1 = x + sa

    # ---------------- LayerNorm 2 + FeedForward (chunked hidden dim) + residual 2 ------
    xn2 = _layernorm(x1, ln2g_ref[...], ln2b_ref[...])
    xn2_b = xn2.astype(jnp.bfloat16)
    hidden = w1_ref.shape[1]
    chunk = hidden if hidden <= 2048 else 2048          # bound h1's live size (R*chunk)
    if hidden % chunk != 0:
        chunk = hidden
    ff = jnp.zeros((R, C), jnp.float32)
    for c0 in range(0, hidden, chunk):                  # static, small trip count
        h1 = jnp.dot(xn2_b, w1_ref[:, c0:c0 + chunk],
                     preferred_element_type=jnp.float32) + b1_ref[:, c0:c0 + chunk]
        h1 = jnp.maximum(h1, 0.0)                       # ReLU
        ff = ff + jnp.dot(h1.astype(jnp.bfloat16), w2_ref[c0:c0 + chunk, :],
                          preferred_element_type=jnp.float32)
    ff = ff + b2_ref[...]

    out_ref[...] = (x1 + ff).reshape(bb, T, C)


def prepare_params(params):
    """One-time param prep: fuse QKV and cast matmul weights to bf16 (hoisted out of
    the per-call path so the convert does not add per-invocation HBM traffic)."""
    (ln1g, ln1b, wq, wk, wv, wp, bp, ln2g, ln2b, w1, b1, w2, b2) = params
    wqkv = jnp.concatenate([wq, wk, wv], axis=1).astype(jnp.bfloat16)   # (C, 3C)
    return (ln1g, ln1b, wqkv,
            wp.astype(jnp.bfloat16), bp,
            ln2g, ln2b,
            w1.astype(jnp.bfloat16), b1,
            w2.astype(jnp.bfloat16), b2)


def _tpu_vmem_info():
    """(vmem_limit_bytes, multi_core) sized per chip generation."""
    try:
        cap = int(pltpu.get_tpu_info().vmem_capacity_bytes)
    except Exception:
        cap = 128 * 1024 * 1024
    # v7x-class: 64 MiB VMEM per TensorCore, 2 TCs per chip.
    multi_core = cap <= 80 * 1024 * 1024
    limit = int(cap * 0.75)          # ~96 MiB on v5e/v6e, ~48 MiB on v7x (headroom)
    return limit, multi_core


def _pick_batch_block(B, T, C, n_head, vmem_limit, multi_core):
    """Largest divisor of B whose estimated VMEM footprint fits the budget.
    Only v7x-class chips (2 TCs) keep >= 2 grid iterations; on single-core chips the
    grid is a serial loop, so bigger bb == better MXU fill (aim for R=bb*T in
    multiples of 256 on v6e/v7x, 128 on v5e)."""
    weights = 24 * C * C                                  # resident bf16, single-buffered

    def footprint(bb):
        R = bb * T
        io = 2 * 2 * R * C * 4                            # double-buffered f32 in + out
        body = R * C * 56 + bb * n_head * T * T * 4 + R * min(4 * C, 2048) * 6
        return weights + io + body

    divs = [d for d in range(1, B + 1) if B % d == 0]
    fit = [d for d in divs if footprint(d) <= vmem_limit] or [1]
    bb = max(fit)
    if multi_core and B >= 2:
        smaller = [d for d in fit if d <= B // 2]
        if smaller:
            bb = max(smaller)
    return bb


def _const_spec(arr):
    """Full-array spec with a constant index_map; single-buffered (never re-fetched)."""
    nd = arr.ndim
    idx = lambda i, nd=nd: (0,) * nd
    try:
        return pl.BlockSpec(arr.shape, idx, pipeline_mode=pl.Buffered(1))
    except Exception:                                     # older jax: no pipeline_mode
        return pl.BlockSpec(arr.shape, idx)


def transformer_block(x, prepared_params, *, n_head, batch_block=None):
    B, T, C = x.shape
    head_size = C // n_head
    (ln1g, ln1b, wqkv, wp, bp, ln2g, ln2b, w1, b1, w2, b2) = prepared_params
    # Safety net: if params were not prepared, cast here (one extra convert).
    cast = lambda w: w if w.dtype == jnp.bfloat16 else w.astype(jnp.bfloat16)
    wqkv, wp, w1, w2 = cast(wqkv), cast(wp), cast(w1), cast(w2)

    vmem_limit, multi_core = _tpu_vmem_info()
    if batch_block is None:
        batch_block = _pick_batch_block(B, T, C, n_head, vmem_limit, multi_core)
    assert B % batch_block == 0, "batch_block must divide B"
    grid = (B // batch_block,)

    grid_spec = pltpu.PrefetchScalarGridSpec(
        num_scalar_prefetch=0,
        grid=grid,
        in_specs=[
            pl.BlockSpec((batch_block, T, C), lambda i: (i, 0, 0)),   # x
            _const_spec(ln1g), _const_spec(ln1b),
            _const_spec(wqkv),
            _const_spec(wp), _const_spec(bp),
            _const_spec(ln2g), _const_spec(ln2b),
            _const_spec(w1), _const_spec(b1),
            _const_spec(w2), _const_spec(b2),
        ],
        out_specs=pl.BlockSpec((batch_block, T, C), lambda i: (i, 0, 0)),
    )

    kernel = functools.partial(block_kernel, n_head=n_head, head_size=head_size)
    return pl.pallas_call(
        kernel,
        out_shape=jax.ShapeDtypeStruct((B, T, C), jnp.float32),
        grid_spec=grid_spec,
        compiler_params=pltpu.CompilerParams(
            dimension_semantics=("parallel",),
            vmem_limit_bytes=vmem_limit),
    )(x, ln1g, ln1b, wqkv, wp, bp, ln2g, ln2b, w1, b1, w2, b2)


def reference_block(x, params, *, n_head):
    """Pure-JAX fp32 reference mirroring the PyTorch Block forward."""
    (ln1g, ln1b, wq, wk, wv, wp, bp, ln2g, ln2b, w1, b1, w2, b2) = params
    B, T, C = x.shape
    hs = C // n_head

    xn = _layernorm(x, ln1g, ln1b)
    q, k, v = xn @ wq, xn @ wk, xn @ wv
    outs = []
    for h in range(n_head):
        qh, kh, vh = (a[..., h * hs:(h + 1) * hs] for a in (q, k, v))
        wei = jnp.einsum('btd,bsd->bts', qh, kh) * (C ** -0.5)
        wei = jax.nn.softmax(wei, axis=-1)
        outs.append(jnp.einsum('bts,bsd->btd', wei, vh))
    sa = jnp.concatenate(outs, axis=-1) @ wp + bp
    x1 = x + sa
    xn2 = _layernorm(x1, ln2g, ln2b)
    ff = jnp.maximum(xn2 @ w1 + b1, 0.0) @ w2 + b2
    return x1 + ff


if __name__ == "__main__":
    # Demo shapes.  Production guidance: keep C a multiple of 128 and target
    # R = bb*T as a multiple of 256 on v6e/v7x (128 on v5e) for full MXU fill.
    B, T, n_embd, n_head = 2, 8, 32, 4

    key = jax.random.PRNGKey(0)
    ks = jax.random.split(key, 12)

    def nrm(k, shape, scale=0.02):
        return (scale * jax.random.normal(k, shape)).astype(jnp.float32)

    # Parameters (deterministic synthetic init; Linear weights stored (in, out);
    # wq/wk/wv are the lane-concatenation of per-head projections).
    ln1g = jnp.ones((1, n_embd), jnp.float32)
    ln1b = jnp.zeros((1, n_embd), jnp.float32)
    ln2g = jnp.ones((1, n_embd), jnp.float32)
    ln2b = jnp.zeros((1, n_embd), jnp.float32)
    wq = nrm(ks[0], (n_embd, n_embd))
    wk = nrm(ks[1], (n_embd, n_embd))
    wv = nrm(ks[2], (n_embd, n_embd))
    wp = nrm(ks[3], (n_embd, n_embd))
    bp = nrm(ks[4], (1, n_embd))
    w1 = nrm(ks[5], (n_embd, 4 * n_embd))
    b1 = nrm(ks[6], (1, 4 * n_embd))
    w2 = nrm(ks[7], (4 * n_embd, n_embd))
    b2 = nrm(ks[8], (1, n_embd))

    raw_params = (ln1g, ln1b, wq, wk, wv, wp, bp, ln2g, ln2b, w1, b1, w2, b2)
    params = jax.block_until_ready(prepare_params(raw_params))   # one-time prep

    x = jax.random.normal(ks[9], (B, T, n_embd), jnp.float32)

    out = transformer_block(x, params, n_head=n_head)
    out = jax.block_until_ready(out)

    ref = reference_block(x, raw_params, n_head=n_head)
    assert out.shape == (B, T, n_embd)
    # bf16 MXU inputs + approx reciprocal => loose tolerance vs fp32 reference.
    assert jnp.allclose(out, ref, atol=2e-2, rtol=2e-2), "mismatch vs reference"

    print("KERNEL_OK")
</pallas_src>

<mosaic_0001>
module attributes {stable_mosaic.version = 11 : i64} {
  func.func @block_kernel(%arg0: i32, %arg1: memref<2x8x32xf32, #tpu.memory_space<vmem>>, %arg2: memref<1x32xf32, #tpu.memory_space<vmem>>, %arg3: memref<1x32xf32, #tpu.memory_space<vmem>>, %arg4: memref<32x96xbf16, #tpu.memory_space<vmem>>, %arg5: memref<32x32xbf16, #tpu.memory_space<vmem>>, %arg6: memref<1x32xf32, #tpu.memory_space<vmem>>, %arg7: memref<1x32xf32, #tpu.memory_space<vmem>>, %arg8: memref<1x32xf32, #tpu.memory_space<vmem>>, %arg9: memref<32x128xbf16, #tpu.memory_space<vmem>>, %arg10: memref<1x128xf32, #tpu.memory_space<vmem>>, %arg11: memref<128x32xbf16, #tpu.memory_space<vmem>>, %arg12: memref<1x32xf32, #tpu.memory_space<vmem>>, %arg13: memref<2x8x32xf32, #tpu.memory_space<vmem>>) attributes {dimension_semantics = [#tpu.dimension_semantics<parallel>], iteration_bounds = array<i64: 1>, scalar_prefetch = 0 : i64, scratch_operands = 0 : i64, tpu.core_type = #tpu.core_type<tc>, window_params = [{transform_indices = @transform_0, window_bounds = array<i64: 2, 8, 32>}, {pipeline_mode = #tpu.pipeline_mode<synchronous>, transform_indices = @transform_1, window_bounds = array<i64: 1, 32>}, {pipeline_mode = #tpu.pipeline_mode<synchronous>, transform_indices = @transform_2, window_bounds = array<i64: 1, 32>}, {pipeline_mode = #tpu.pipeline_mode<synchronous>, transform_indices = @transform_3, window_bounds = array<i64: 32, 96>}, {pipeline_mode = #tpu.pipeline_mode<synchronous>, transform_indices = @transform_4, window_bounds = array<i64: 32, 32>}, {pipeline_mode = #tpu.pipeline_mode<synchronous>, transform_indices = @transform_5, window_bounds = array<i64: 1, 32>}, {pipeline_mode = #tpu.pipeline_mode<synchronous>, transform_indices = @transform_6, window_bounds = array<i64: 1, 32>}, {pipeline_mode = #tpu.pipeline_mode<synchronous>, transform_indices = @transform_7, window_bounds = array<i64: 1, 32>}, {pipeline_mode = #tpu.pipeline_mode<synchronous>, transform_indices = @transform_8, window_bounds = array<i64: 32, 128>}, {pipeline_mode = #tpu.pipeline_mode<synchronous>, transform_indices = @transform_9, window_bounds = array<i64: 1, 128>}, {pipeline_mode = #tpu.pipeline_mode<synchronous>, transform_indices = @transform_10, window_bounds = array<i64: 128, 32>}, {pipeline_mode = #tpu.pipeline_mode<synchronous>, transform_indices = @transform_11, window_bounds = array<i64: 1, 32>}, {transform_indices = @transform_12, window_bounds = array<i64: 2, 8, 32>}]} {
    %c0 = arith.constant 0 : index
    %c0_0 = arith.constant 0 : index
    %c0_1 = arith.constant 0 : index
    %0 = vector.load %arg1[%c0, %c0_0, %c0_1] : memref<2x8x32xf32, #tpu.memory_space<vmem>>, vector<2x8x32xf32>
    %1 = vector.shape_cast %0 : vector<2x8x32xf32> to vector<16x32xf32>
    %c0_2 = arith.constant 0 : index
    %c0_3 = arith.constant 0 : index
    %2 = vector.load %arg2[%c0_2, %c0_3] : memref<1x32xf32, #tpu.memory_space<vmem>>, vector<1x32xf32>
    %c0_4 = arith.constant 0 : index
    %c0_5 = arith.constant 0 : index
    %3 = vector.load %arg3[%c0_4, %c0_5] : memref<1x32xf32, #tpu.memory_space<vmem>>, vector<1x32xf32>
    %cst = arith.constant dense<0.000000e+00> : vector<16xf32>
    %4 = vector.multi_reduction <add>, %1, %cst [1] : vector<16x32xf32> to vector<16xf32>
    %5 = vector.shape_cast %4 : vector<16xf32> to vector<16x1xf32>
    %cst_6 = arith.constant 3.200000e+01 : f32
    %6 = vector.broadcast %cst_6 : f32 to vector<16x1xf32>
    %7 = arith.divf %5, %6 : vector<16x1xf32>
    %8 = vector.broadcast %7 : vector<16x1xf32> to vector<16x32xf32>
    %9 = arith.subf %1, %8 : vector<16x32xf32>
    %10 = arith.mulf %9, %9 : vector<16x32xf32>
    %cst_7 = arith.constant dense<0.000000e+00> : vector<16xf32>
    %11 = vector.multi_reduction <add>, %10, %cst_7 [1] : vector<16x32xf32> to vector<16xf32>
    %12 = vector.shape_cast %11 : vector<16xf32> to vector<16x1xf32>
    %cst_8 = arith.constant 3.200000e+01 : f32
    %13 = vector.broadcast %cst_8 : f32 to vector<16x1xf32>
    %14 = arith.divf %12, %13 : vector<16x1xf32>
    %cst_9 = arith.constant 9.99999974E-6 : f32
    %15 = vector.broadcast %cst_9 : f32 to vector<16x1xf32>
    %16 = arith.addf %14, %15 : vector<16x1xf32>
    %17 = math.rsqrt %16 : vector<16x1xf32>
    %18 = vector.broadcast %17 : vector<16x1xf32> to vector<16x32xf32>
    %19 = arith.mulf %9, %18 : vector<16x32xf32>
    %20 = vector.broadcast %2 : vector<1x32xf32> to vector<16x32xf32>
    %21 = arith.mulf %19, %20 : vector<16x32xf32>
    %22 = vector.broadcast %3 : vector<1x32xf32> to vector<16x32xf32>
    %23 = arith.addf %21, %22 : vector<16x32xf32>
    %24 = arith.truncf %23 : vector<16x32xf32> to vector<16x32xbf16>
    %c0_10 = arith.constant 0 : index
    %c0_11 = arith.constant 0 : index
    %25 = vector.load %arg4[%c0_10, %c0_11] : memref<32x96xbf16, #tpu.memory_space<vmem>>, vector<32x96xbf16>
    %cst_12 = arith.constant dense<0.000000e+00> : vector<16x96xf32>
    %26 = tpu.matmul %24, %25, %cst_12 {dimension_numbers = #tpu.dot_dimension_numbers<[1], [0], [0], [1], [0, 0, 1, 1], [], []>} : vector<16x32xbf16>, vector<32x96xbf16>, vector<16x96xf32> -> vector<16x96xf32>
    %27 = vector.extract_strided_slice %26 {offsets = [0, 0], sizes = [16, 32], strides = [1, 1]} : vector<16x96xf32> to vector<16x32xf32>
    %cst_13 = arith.constant 0.176776692 : f32
    %28 = vector.broadcast %cst_13 : f32 to vector<16x32xf32>
    %29 = arith.mulf %27, %28 : vector<16x32xf32>
    %30 = arith.truncf %29 : vector<16x32xf32> to vector<16x32xbf16>
    %31 = vector.extract_strided_slice %26 {offsets = [0, 32], sizes = [16, 32], strides = [1, 1]} : vector<16x96xf32> to vector<16x32xf32>
    %32 = arith.truncf %31 : vector<16x32xf32> to vector<16x32xbf16>
    %33 = vector.extract_strided_slice %26 {offsets = [0, 64], sizes = [16, 32], strides = [1, 1]} : vector<16x96xf32> to vector<16x32xf32>
    %34 = arith.truncf %33 : vector<16x32xf32> to vector<16x32xbf16>
    %35 = vector.shape_cast %30 : vector<16x32xbf16> to vector<2x8x4x8xbf16>
    %36 = tpu.transpose %35, [0, 2, 1, 3] : vector<2x8x4x8xbf16> -> vector<2x4x8x8xbf16>
    %37 = vector.shape_cast %36 : vector<2x4x8x8xbf16> to vector<8x8x8xbf16>
    %38 = vector.shape_cast %32 : vector<16x32xbf16> to vector<2x8x4x8xbf16>
    %39 = tpu.transpose %38, [0, 2, 1, 3] : vector<2x8x4x8xbf16> -> vector<2x4x8x8xbf16>
    %40 = vector.shape_cast %39 : vector<2x4x8x8xbf16> to vector<8x8x8xbf16>
    %41 = vector.shape_cast %34 : vector<16x32xbf16> to vector<2x8x4x8xbf16>
    %42 = tpu.transpose %41, [0, 2, 1, 3] : vector<2x8x4x8xbf16> -> vector<2x4x8x8xbf16>
    %43 = vector.shape_cast %42 : vector<2x4x8x8xbf16> to vector<8x8x8xbf16>
    "tpu.trace_start"() <{level = 10 : i32, message = "ntd,nsd->nts"}> : () -> ()
    %cst_14 = arith.constant dense<0.000000e+00> : vector<8x8x8xf32>
    %44 = tpu.matmul %37, %40, %cst_14 {dimension_numbers = #tpu.dot_dimension_numbers<[2], [2], [1], [1], [0, 0, 0, 1, 1, 1], [0], [0]>} : vector<8x8x8xbf16>, vector<8x8x8xbf16>, vector<8x8x8xf32> -> vector<8x8x8xf32>
    "tpu.trace_stop"() : () -> ()
    %cst_15 = arith.constant dense<0xFF800000> : vector<8x8xf32>
    %45 = vector.multi_reduction <maximumf>, %44, %cst_15 [2] : vector<8x8x8xf32> to vector<8x8xf32>
    %46 = vector.shape_cast %45 : vector<8x8xf32> to vector<8x8x1xf32>
    %47 = vector.broadcast %46 : vector<8x8x1xf32> to vector<8x8x8xf32>
    %48 = arith.subf %44, %47 : vector<8x8x8xf32>
    %49 = math.exp %48 : vector<8x8x8xf32>
    %cst_16 = arith.constant dense<0.000000e+00> : vector<8x8xf32>
    %50 = vector.multi_reduction <add>, %49, %cst_16 [2] : vector<8x8x8xf32> to vector<8x8xf32>
    %51 = vector.shape_cast %50 : vector<8x8xf32> to vector<8x8x1xf32>
    %52 = tpu.reciprocal %51 {approx = true} : vector<8x8x1xf32> -> vector<8x8x1xf32>
    %53 = vector.broadcast %52 : vector<8x8x1xf32> to vector<8x8x8xf32>
    %54 = arith.mulf %49, %53 : vector<8x8x8xf32>
    %55 = arith.truncf %54 : vector<8x8x8xf32> to vector<8x8x8xbf16>
    "tpu.trace_start"() <{level = 10 : i32, message = "nts,nsd->ntd"}> : () -> ()
    %cst_17 = arith.constant dense<0.000000e+00> : vector<8x8x8xf32>
    %56 = tpu.matmul %55, %43, %cst_17 {dimension_numbers = #tpu.dot_dimension_numbers<[2], [1], [1], [2], [0, 0, 0, 1, 1, 2], [0], [0]>} : vector<8x8x8xbf16>, vector<8x8x8xbf16>, vector<8x8x8xf32> -> vector<8x8x8xf32>
    "tpu.trace_stop"() : () -> ()
    %57 = vector.shape_cast %56 : vector<8x8x8xf32> to vector<2x4x8x8xf32>
    %58 = tpu.transpose %57, [0, 2, 1, 3] : vector<2x4x8x8xf32> -> vector<2x8x4x8xf32>
    %59 = vector.shape_cast %58 : vector<2x8x4x8xf32> to vector<16x32xf32>
    %60 = arith.truncf %59 : vector<16x32xf32> to vector<16x32xbf16>
    %c0_18 = arith.constant 0 : index
    %c0_19 = arith.constant 0 : index
    %61 = vector.load %arg5[%c0_18, %c0_19] : memref<32x32xbf16, #tpu.memory_space<vmem>>, vector<32x32xbf16>
    %cst_20 = arith.constant dense<0.000000e+00> : vector<16x32xf32>
    %62 = tpu.matmul %60, %61, %cst_20 {dimension_numbers = #tpu.dot_dimension_numbers<[1], [0], [0], [1], [0, 0, 1, 1], [], []>} : vector<16x32xbf16>, vector<32x32xbf16>, vector<16x32xf32> -> vector<16x32xf32>
    %c0_21 = arith.constant 0 : index
    %c0_22 = arith.constant 0 : index
    %63 = vector.load %arg6[%c0_21, %c0_22] : memref<1x32xf32, #tpu.memory_space<vmem>>, vector<1x32xf32>
    %64 = vector.broadcast %63 : vector<1x32xf32> to vector<16x32xf32>
    %65 = arith.addf %62, %64 : vector<16x32xf32>
    %66 = arith.addf %1, %65 : vector<16x32xf32>
    %c0_23 = arith.constant 0 : index
    %c0_24 = arith.constant 0 : index
    %67 = vector.load %arg7[%c0_23, %c0_24] : memref<1x32xf32, #tpu.memory_space<vmem>>, vector<1x32xf32>
    %c0_25 = arith.constant 0 : index
    %c0_26 = arith.constant 0 : index
    %68 = vector.load %arg8[%c0_25, %c0_26] : memref<1x32xf32, #tpu.memory_space<vmem>>, vector<1x32xf32>
    %cst_27 = arith.constant dense<0.000000e+00> : vector<16xf32>
    %69 = vector.multi_reduction <add>, %66, %cst_27 [1] : vector<16x32xf32> to vector<16xf32>
    %70 = vector.shape_cast %69 : vector<16xf32> to vector<16x1xf32>
    %cst_28 = arith.constant 3.200000e+01 : f32
    %71 = vector.broadcast %cst_28 : f32 to vector<16x1xf32>
    %72 = arith.divf %70, %71 : vector<16x1xf32>
    %73 = vector.broadcast %72 : vector<16x1xf32> to vector<16x32xf32>
    %74 = arith.subf %66, %73 : vector<16x32xf32>
    %75 = arith.mulf %74, %74 : vector<16x32xf32>
    %cst_29 = arith.constant dense<0.000000e+00> : vector<16xf32>
    %76 = vector.multi_reduction <add>, %75, %cst_29 [1] : vector<16x32xf32> to vector<16xf32>
    %77 = vector.shape_cast %76 : vector<16xf32> to vector<16x1xf32>
    %cst_30 = arith.constant 3.200000e+01 : f32
    %78 = vector.broadcast %cst_30 : f32 to vector<16x1xf32>
    %79 = arith.divf %77, %78 : vector<16x1xf32>
    %cst_31 = arith.constant 9.99999974E-6 : f32
    %80 = vector.broadcast %cst_31 : f32 to vector<16x1xf32>
    %81 = arith.addf %79, %80 : vector<16x1xf32>
    %82 = math.rsqrt %81 : vector<16x1xf32>
    %83 = vector.broadcast %82 : vector<16x1xf32> to vector<16x32xf32>
    %84 = arith.mulf %74, %83 : vector<16x32xf32>
    %85 = vector.broadcast %67 : vector<1x32xf32> to vector<16x32xf32>
    %86 = arith.mulf %84, %85 : vector<16x32xf32>
    %87 = vector.broadcast %68 : vector<1x32xf32> to vector<16x32xf32>
    %88 = arith.addf %86, %87 : vector<16x32xf32>
    %89 = arith.truncf %88 : vector<16x32xf32> to vector<16x32xbf16>
    %cst_32 = arith.constant 0.000000e+00 : f32
    %90 = vector.broadcast %cst_32 : f32 to vector<16x32xf32>
    %c0_33 = arith.constant 0 : index
    %c0_34 = arith.constant 0 : index
    %91 = vector.load %arg9[%c0_33, %c0_34] : memref<32x128xbf16, #tpu.memory_space<vmem>>, vector<32x128xbf16>
    %cst_35 = arith.constant dense<0.000000e+00> : vector<16x128xf32>
    %92 = tpu.matmul %89, %91, %cst_35 {dimension_numbers = #tpu.dot_dimension_numbers<[1], [0], [0], [1], [0, 0, 1, 1], [], []>} : vector<16x32xbf16>, vector<32x128xbf16>, vector<16x128xf32> -> vector<16x128xf32>
    %c0_36 = arith.constant 0 : index
    %c0_37 = arith.constant 0 : index
    %93 = vector.load %arg10[%c0_36, %c0_37] : memref<1x128xf32, #tpu.memory_space<vmem>>, vector<1x128xf32>
    %94 = vector.broadcast %93 : vector<1x128xf32> to vector<16x128xf32>
    %95 = arith.addf %92, %94 : vector<16x128xf32>
    %cst_38 = arith.constant 0.000000e+00 : f32
    %96 = vector.broadcast %cst_38 : f32 to vector<16x128xf32>
    %97 = arith.maximumf %95, %96 : vector<16x128xf32>
    %98 = arith.truncf %97 : vector<16x128xf32> to vector<16x128xbf16>
    %c0_39 = arith.constant 0 : index
    %c0_40 = arith.constant 0 : index
    %99 = vector.load %arg11[%c0_39, %c0_40] : memref<128x32xbf16, #tpu.memory_space<vmem>>, vector<128x32xbf16>
    %cst_41 = arith.constant dense<0.000000e+00> : vector<16x32xf32>
    %100 = tpu.matmul %98, %99, %cst_41 {dimension_numbers = #tpu.dot_dimension_numbers<[1], [0], [0], [1], [0, 0, 1, 1], [], []>} : vector<16x128xbf16>, vector<128x32xbf16>, vector<16x32xf32> -> vector<16x32xf32>
    %101 = arith.addf %90, %100 : vector<16x32xf32>
    %c0_42 = arith.constant 0 : index
    %c0_43 = arith.constant 0 : index
    %102 = vector.load %arg12[%c0_42, %c0_43] : memref<1x32xf32, #tpu.memory_space<vmem>>, vector<1x32xf32>
    %103 = vector.broadcast %102 : vector<1x32xf32> to vector<16x32xf32>
    %104 = arith.addf %101, %103 : vector<16x32xf32>
    %105 = arith.addf %66, %104 : vector<16x32xf32>
    %106 = vector.shape_cast %105 : vector<16x32xf32> to vector<2x8x32xf32>
    %c0_44 = arith.constant 0 : index
    %c0_45 = arith.constant 0 : index
    %c0_46 = arith.constant 0 : index
    %107 = vector.load %arg13[%c0_44, %c0_45, %c0_46] : memref<2x8x32xf32, #tpu.memory_space<vmem>>, vector<2x8x32xf32>
    tpu.vector_store %arg13[%c0_44, %c0_45, %c0_46], %106 {strides = array<i32>} : memref<2x8x32xf32, #tpu.memory_space<vmem>>, vector<2x8x32xf32>,
    return
  }
  func.func @transform_0(%arg0: i32) -> (i32, i32, i32) {
    %c0_i32 = arith.constant 0 : i32
    %c0_i32_0 = arith.constant 0 : i32
    %c0_i32_1 = arith.constant 0 : i32
    return %arg0, %c0_i32, %c0_i32_0 : i32, i32, i32
  }
  func.func @transform_1(%arg0: i32) -> (i32, i32) {
    %c0_i32 = arith.constant 0 : i32
    %c0_i32_0 = arith.constant 0 : i32
    %c0_i32_1 = arith.constant 0 : i32
    return %c0_i32, %c0_i32_0 : i32, i32
  }
  func.func @transform_2(%arg0: i32) -> (i32, i32) {
    %c0_i32 = arith.constant 0 : i32
    %c0_i32_0 = arith.constant 0 : i32
    %c0_i32_1 = arith.constant 0 : i32
    return %c0_i32, %c0_i32_0 : i32, i32
  }
  func.func @transform_3(%arg0: i32) -> (i32, i32) {
    %c0_i32 = arith.constant 0 : i32
    %c0_i32_0 = arith.constant 0 : i32
    %c0_i32_1 = arith.constant 0 : i32
    return %c0_i32, %c0_i32_0 : i32, i32
  }
  func.func @transform_4(%arg0: i32) -> (i32, i32) {
    %c0_i32 = arith.constant 0 : i32
    %c0_i32_0 = arith.constant 0 : i32
    %c0_i32_1 = arith.constant 0 : i32
    return %c0_i32, %c0_i32_0 : i32, i32
  }
  func.func @transform_5(%arg0: i32) -> (i32, i32) {
    %c0_i32 = arith.constant 0 : i32
    %c0_i32_0 = arith.constant 0 : i32
    %c0_i32_1 = arith.constant 0 : i32
    return %c0_i32, %c0_i32_0 : i32, i32
  }
  func.func @transform_6(%arg0: i32) -> (i32, i32) {
    %c0_i32 = arith.constant 0 : i32
    %c0_i32_0 = arith.constant 0 : i32
    %c0_i32_1 = arith.constant 0 : i32
    return %c0_i32, %c0_i32_0 : i32, i32
  }
  func.func @transform_7(%arg0: i32) -> (i32, i32) {
    %c0_i32 = arith.constant 0 : i32
    %c0_i32_0 = arith.constant 0 : i32
    %c0_i32_1 = arith.constant 0 : i32
    return %c0_i32, %c0_i32_0 : i32, i32
  }
  func.func @transform_8(%arg0: i32) -> (i32, i32) {
    %c0_i32 = arith.constant 0 : i32
    %c0_i32_0 = arith.constant 0 : i32
    %c0_i32_1 = arith.constant 0 : i32
    return %c0_i32, %c0_i32_0 : i32, i32
  }
  func.func @transform_9(%arg0: i32) -> (i32, i32) {
    %c0_i32 = arith.constant 0 : i32
    %c0_i32_0 = arith.constant 0 : i32
    %c0_i32_1 = arith.constant 0 : i32
    return %c0_i32, %c0_i32_0 : i32, i32
  }
  func.func @transform_10(%arg0: i32) -> (i32, i32) {
    %c0_i32 = arith.constant 0 : i32
    %c0_i32_0 = arith.constant 0 : i32
    %c0_i32_1 = arith.constant 0 : i32
    return %c0_i32, %c0_i32_0 : i32, i32
  }
  func.func @transform_11(%arg0: i32) -> (i32, i32) {
    %c0_i32 = arith.constant 0 : i32
    %c0_i32_0 = arith.constant 0 : i32
    %c0_i32_1 = arith.constant 0 : i32
    return %c0_i32, %c0_i32_0 : i32, i32
  }
  func.func @transform_12(%arg0: i32) -> (i32, i32, i32) {
    %c0_i32 = arith.constant 0 : i32
    %c0_i32_0 = arith.constant 0 : i32
    %c0_i32_1 = arith.constant 0 : i32
    return %arg0, %c0_i32, %c0_i32_0 : i32, i32, i32
  }
}

</mosaic_0001>

<bundles_post_ra>
// kernel: tpu_custom_call.1
= control target key start
LH: loop header
LB: loop body
LE: loop exit
PB: predicated region body
PF: predicated region fallthrough
CT: control target
= control target key end

     0   :  { %17 = vsyncpa [#allocation3], 0  ;;  %s3931_s0 = inlined_call_operand.hbm [shape: f32[2,8,32], index: 0, kind: input, shape index: {}]   ;;  %s3932_s1 = inlined_call_operand.hbm [shape: f32[1,32], index: 1, kind: input, shape index: {}]   ;;  %s3933_s2 = inlined_call_operand.hbm [shape: f32[1,32], index: 2, kind: input, shape index: {}]   ;;  %s3934_s3 = inlined_call_operand.hbm [shape: bf16[32,96], index: 3, kind: input, shape index: {}]   ;;  %s3935_s4 = inlined_call_operand.hbm [shape: bf16[32,32], index: 4, kind: input, shape index: {}]   ;;  %s3936_s5 = inlined_call_operand.hbm [shape: f32[1,32], index: 5, kind: input, shape index: {}]   ;;  %s3937_s6 = inlined_call_operand.hbm [shape: f32[1,32], index: 6, kind: input, shape index: {}]   ;;  %s3938_s7 = inlined_call_operand.hbm [shape: f32[1,32], index: 7, kind: input, shape index: {}]   ;;  %s3939_s8 = inlined_call_operand.hbm [shape: bf16[32,128], index: 8, kind: input, shape index: {}]   ;;  %s3940_s9 = inlined_call_operand.hbm [shape: f32[1,128], index: 9, kind: input, shape index: {}]   ;;  %s3941_s10 = inlined_call_operand.hbm [shape: bf16[128,32], index: 10, kind: input, shape index: {}]   ;;  %s3942_s11 = inlined_call_operand.hbm [shape: f32[1,32], index: 11, kind: input, shape index: {}]   ;;  %s3943_s12 = inlined_call_operand.hbm [shape: f32[2,8,32], index: 12, kind: output, shape index: {}]  }
   0x1   :  { %18 = vsyncpa [#allocation6], 0 }
   0x2   :  { %19 = vsyncpa [#allocation9], 0 }
   0x3   :  { %20 = vsyncpa [#allocation12], 0 }
   0x4   :  { %21 = vsyncpa [#allocation15], 0 }
   0x5   :  { %22 = vsyncpa [#allocation18], 0 }
   0x6   :  { %23 = vsyncpa [#allocation21], 0 }
   0x7   :  { %24 = vsyncpa [#allocation4], 0  ;;  %s3266_s21 = smov [#allocation5]   ;;  %s3267_s23 = smov [#allocation8]  }
   0x8   :  { %s43_s22 = sshll.u32 %s3266_s21, 4  ;;  %s62_s24 = sshll.u32 %s3267_s23, 4  ;;  %s44_s22 = int_to_ptr.vmem [resolvable:$true] %s43_s22  ;;  %s3359_s24 = int_to_ptr.vmem [resolvable:$true] %s62_s24 }
   0x9   :  { %s2964_s27 = scalar_lea.hbm %s3932_s1, 16 }
   0xa   :  { %p2965_p0 = scmp.ne.s32.totalorder %s3932_s1, %s2964_s27  ;;  %p2968_p1 = scmp.lt.u32.totalorder %s2964_s27, %s3932_s1 }
   0xc   :  { %p2970_p2 = pnand %p2968_p1, %p2965_p0 }
   0xe   :  { %2973 = shalt.err (!%p2970_p2)
}
   0xf   :  { %s2974_s14 = scalar_lea.vmem %s44_s22, 16  ;;  %s2978_s15 = scalar_lea.vmem %s44_s22, 32 }
  0x10   :  { %p2975_p3 = scmp.ne.s32.totalorder %s44_s22, %s2974_s14  ;;  %p2979_p4 = scmp.lt.s32.totalorder %s44_s22, %s44_s22 }
  0x11   :  { %p2980_p5 = scmp.lt.s32.totalorder %s2978_s15, %s2974_s14 }
  0x13   :  { %p2981_p6 = por %p2980_p5, %p2979_p4 }
  0x15   :  { %p2982_p7 = pnand %p2981_p6, %p2975_p3 }
  0x17   :  { %2985 = shalt.err (!%p2982_p7)
}
  0x18   :  { %46 = dma.hbm_to_vmem [thread:$0]  %s3932_s1, 16, %s44_s22, [#allocation6]  }
  0x19   :  { %s2986_s20 = scalar_lea.hbm %s3934_s3, 256 }
  0x1a   :  { %p2987_p8 = scmp.ne.s32.totalorder %s3934_s3, %s2986_s20  ;;  %p2990_p9 = scmp.lt.u32.totalorder %s2986_s20, %s3934_s3 }
  0x1c   :  { %p2992_p10 = pnand %p2990_p9, %p2987_p8 }
  0x1e   :  { %2995 = shalt.err (!%p2992_p10)
}
  0x1f   :  { %s2996_s27 = scalar_lea.vmem %s3359_s24, 256  ;;  %p3001_p12 = scmp.lt.s32.totalorder %s3359_s24, %s3359_s24 }
  0x20   :  { %p2997_p11 = scmp.ne.s32.totalorder %s3359_s24, %s2996_s27  ;;  %p3002_p13 = scmp.lt.s32.totalorder %s2996_s27, %s2996_s27 }
  0x22   :  { %p3003_p0 = por %p3002_p13, %p3001_p12 }
  0x24   :  { %p3004_p1 = pnand %p3003_p0, %p2997_p11 }
  0x26   :  { %3007 = shalt.err (!%p3004_p1)
}
  0x27   :  { %s3268_s1 = smov 64   ;;  %s3269_s22 = smov 4  }
  0x28   :  { %68 = dma.hbm_to_vmem [thread:$0]  %s3934_s3, 256, %s3359_s24, [#allocation9], %s3268_s1, %s3268_s1, %s3269_s22  }
  0x29   :  { %s3270_s30 = smov [#allocation11]   ;;  %s3271_s14 = smov [#allocation14]  }
  0x2a   :  { %s87_s13 = sshll.u32 %s3270_s30, 4  ;;  %s107_s15 = sshll.u32 %s3271_s14, 4  ;;  %s88_s13 = int_to_ptr.vmem [resolvable:$true] %s87_s13  ;;  %s108_s15 = int_to_ptr.vmem [resolvable:$true] %s107_s15 }
  0x2b   :  { %s3008_s18 = scalar_lea.hbm %s3936_s5, 16 }
  0x2c   :  { %p3009_p2 = scmp.ne.s32.totalorder %s3936_s5, %s3008_s18  ;;  %p3012_p3 = scmp.lt.u32.totalorder %s3008_s18, %s3936_s5 }
  0x2e   :  { %p3014_p4 = pnand %p3012_p3, %p3009_p2 }
  0x30   :  { %3017 = shalt.err (!%p3014_p4)
}
  0x31   :  { %s3018_s3 = scalar_lea.vmem %s88_s13, 16  ;;  %s3022_s24 = scalar_lea.vmem %s88_s13, 32 }
  0x32   :  { %p3019_p5 = scmp.ne.s32.totalorder %s88_s13, %s3018_s3  ;;  %p3023_p6 = scmp.lt.s32.totalorder %s88_s13, %s88_s13 }
  0x33   :  { %p3024_p7 = scmp.lt.s32.totalorder %s3022_s24, %s3018_s3 }
  0x35   :  { %p3025_p8 = por %p3024_p7, %p3023_p6 }
  0x37   :  { %p3026_p9 = pnand %p3025_p8, %p3019_p5 }
  0x39   :  { %3029 = shalt.err (!%p3026_p9)
}
  0x3a   :  { %90 = dma.hbm_to_vmem [thread:$0]  %s3936_s5, 16, %s88_s13, [#allocation12]  }
  0x3b   :  { %s3030_s29 = scalar_lea.hbm %s3938_s7, 16 }
  0x3c   :  { %p3031_p10 = scmp.ne.s32.totalorder %s3938_s7, %s3030_s29  ;;  %p3034_p11 = scmp.lt.u32.totalorder %s3030_s29, %s3938_s7 }
  0x3e   :  { %p3036_p12 = pnand %p3034_p11, %p3031_p10 }
  0x40   :  { %3039 = shalt.err (!%p3036_p12)
}
  0x41   :  { %s3040_s18 = scalar_lea.vmem %s108_s15, 16  ;;  %s3044_s19 = scalar_lea.vmem %s108_s15, 32 }
  0x42   :  { %p3041_p13 = scmp.ne.s32.totalorder %s108_s15, %s3040_s18  ;;  %p3045_p0 = scmp.lt.s32.totalorder %s108_s15, %s108_s15 }
  0x43   :  { %p3046_p1 = scmp.lt.s32.totalorder %s3044_s19, %s3040_s18 }
  0x45   :  { %p3047_p2 = por %p3046_p1, %p3045_p0 }
  0x47   :  { %p3048_p3 = pnand %p3047_p2, %p3041_p13 }
  0x49   :  { %3051 = shalt.err (!%p3048_p3)
}
  0x4a   :  { %110 = dma.hbm_to_vmem [thread:$0]  %s3938_s7, 16, %s108_s15, [#allocation15]  }
  0x4b   :  { %s3272_s20 = smov [#allocation17]   ;;  %s3273_s23 = smov [#allocation2]  }
  0x4c   :  { %s129_s21 = sshll.u32 %s3272_s20, 4  ;;  %s30_s3 = sshll.u32 %s3273_s23, 4  ;;  %s130_s21 = int_to_ptr.vmem [resolvable:$true] %s129_s21  ;;  %s3417_s3 = int_to_ptr.vmem [resolvable:$true] %s30_s3 }
  0x4d   :  { %s3052_s26 = scalar_lea.hbm %s3940_s9, 16 }
  0x4e   :  { %p3053_p4 = scmp.ne.s32.totalorder %s3940_s9, %s3052_s26  ;;  %p3056_p5 = scmp.lt.u32.totalorder %s3052_s26, %s3940_s9 }
  0x50   :  { %p3058_p6 = pnand %p3056_p5, %p3053_p4 }
  0x52   :  { %3061 = shalt.err (!%p3058_p6)
}
  0x53   :  { %s3062_s7 = scalar_lea.vmem %s130_s21, 16  ;;  %s3066_s15 = scalar_lea.vmem %s130_s21, 32 }
  0x54   :  { %p3063_p7 = scmp.ne.s32.totalorder %s130_s21, %s3062_s7  ;;  %p3067_p8 = scmp.lt.s32.totalorder %s130_s21, %s130_s21 }
  0x55   :  { %p3068_p9 = scmp.lt.s32.totalorder %s3066_s15, %s3062_s7 }
  0x57   :  { %p3069_p10 = por %p3068_p9, %p3067_p8 }
  0x59   :  { %p3070_p11 = pnand %p3069_p10, %p3063_p7 }
  0x5b   :  { %3073 = shalt.err (!%p3070_p11)
}
  0x5c   :  { %132 = dma.hbm_to_vmem [thread:$0]  %s3940_s9, 16, %s130_s21, [#allocation18]  }
  0x5d   :  { %s3074_s19 = scalar_lea.hbm %s3931_s0, 256 }
  0x5e   :  { %p3075_p12 = scmp.ne.s32.totalorder %s3931_s0, %s3074_s19  ;;  %p3078_p13 = scmp.lt.u32.totalorder %s3074_s19, %s3931_s0 }
  0x60   :  { %p3080_p0 = pnand %p3078_p13, %p3075_p12 }
  0x62   :  { %3083 = shalt.err (!%p3080_p0)
}
  0x63   :  { %s3084_s24 = scalar_lea.vmem %s3417_s3, 256  ;;  %p3089_p2 = scmp.lt.s32.totalorder %s3417_s3, %s3417_s3 }
  0x64   :  { %p3085_p1 = scmp.ne.s32.totalorder %s3417_s3, %s3084_s24  ;;  %p3090_p3 = scmp.lt.s32.totalorder %s3084_s24, %s3084_s24 }
  0x66   :  { %p3091_p4 = por %p3090_p3, %p3089_p2 }
  0x68   :  { %p3092_p5 = pnand %p3091_p4, %p3085_p1 }
  0x6a   :  { %3095 = shalt.err (!%p3092_p5)
}
  0x6b   :  { %s3274_s9 = smov 128   ;;  %s3275_s21 = smov 8  }
  0x6c   :  { %36 = dma.hbm_to_vmem [thread:$0]  %s3931_s0, 256, %s3417_s3, [#allocation3], %s3274_s9, %s3274_s9, %s3275_s21  }
  0x6d   :  { %s3276_s27 = smov [#allocation7]   ;;  %s3277_s29 = smov [#allocation10]  }
  0x6e   :  { %s53_s28 = sshll.u32 %s3276_s27, 4  ;;  %s74_s30 = sshll.u32 %s3277_s29, 4  ;;  %s54_s28 = int_to_ptr.vmem [resolvable:$true] %s53_s28  ;;  %s3451_s30 = int_to_ptr.vmem [resolvable:$true] %s74_s30 }
  0x6f   :  { %s3096_s14 = scalar_lea.hbm %s3933_s2, 16 }
  0x70   :  { %p3097_p6 = scmp.ne.s32.totalorder %s3933_s2, %s3096_s14  ;;  %p3100_p7 = scmp.lt.u32.totalorder %s3096_s14, %s3933_s2 }
  0x72   :  { %p3102_p8 = pnand %p3100_p7, %p3097_p6 }
  0x74   :  { %3105 = shalt.err (!%p3102_p8)
}
  0x75   :  { %s3106_s0 = scalar_lea.vmem %s54_s28, 16  ;;  %s3110_s3 = scalar_lea.vmem %s54_s28, 32 }
  0x76   :  { %p3107_p9 = scmp.ne.s32.totalorder %s54_s28, %s3106_s0  ;;  %p3111_p10 = scmp.lt.s32.totalorder %s54_s28, %s54_s28 }
  0x77   :  { %p3112_p11 = scmp.lt.s32.totalorder %s3110_s3, %s3106_s0 }
  0x79   :  { %p3113_p12 = por %p3112_p11, %p3111_p10 }
  0x7b   :  { %p3114_p13 = pnand %p3113_p12, %p3107_p9 }
  0x7d   :  { %3117 = shalt.err (!%p3114_p13)
}
  0x7e   :  { %56 = dma.hbm_to_vmem [thread:$0]  %s3933_s2, 16, %s54_s28, [#allocation6]  }
  0x7f   :  { %s3118_s24 = scalar_lea.hbm %s3935_s4, 256 }
  0x80   :  { %p3119_p0 = scmp.ne.s32.totalorder %s3935_s4, %s3118_s24  ;;  %p3122_p1 = scmp.lt.u32.totalorder %s3118_s24, %s3935_s4 }
  0x82   :  { %p3124_p2 = pnand %p3122_p1, %p3119_p0 }
  0x84   :  { %3127 = shalt.err (!%p3124_p2)
}
  0x85   :  { %s3128_s7 = scalar_lea.vmem %s3451_s30, 256  ;;  %p3133_p4 = scmp.lt.s32.totalorder %s3451_s30, %s3451_s30 }
  0x86   :  { %p3129_p3 = scmp.ne.s32.totalorder %s3451_s30, %s3128_s7  ;;  %p3134_p5 = scmp.lt.s32.totalorder %s3128_s7, %s3128_s7 }
  0x88   :  { %p3135_p6 = por %p3134_p5, %p3133_p4 }
  0x8a   :  { %p3136_p7 = pnand %p3135_p6, %p3129_p3 }
  0x8c   :  { %3139 = shalt.err (!%p3136_p7)
}
  0x8d   :  { %80 = dma.hbm_to_vmem [thread:$0]  %s3935_s4, 256, %s3451_s30, [#allocation9], %s3268_s1, %s3268_s1, %s3269_s22  }
  0x8e   :  { %s3278_s15 = smov [#allocation13]   ;;  %s3279_s16 = smov [#allocation16]  }
  0x8f   :  { %s97_s14 = sshll.u32 %s3278_s15, 4  ;;  %s116_s17 = sshll.u32 %s3279_s16, 4  ;;  %s98_s14 = int_to_ptr.vmem [resolvable:$true] %s97_s14  ;;  %s3485_s17 = int_to_ptr.vmem [resolvable:$true] %s116_s17 }
  0x90   :  { %s3140_s0 = scalar_lea.hbm %s3937_s6, 16 }
  0x91   :  { %p3141_p8 = scmp.ne.s32.totalorder %s3937_s6, %s3140_s0  ;;  %p3144_p9 = scmp.lt.u32.totalorder %s3140_s0, %s3937_s6 }
  0x93   :  { %p3146_p10 = pnand %p3144_p9, %p3141_p8 }
  0x95   :  { %3149 = shalt.err (!%p3146_p10)
}
  0x96   :  { %s3150_s4 = scalar_lea.vmem %s98_s14, 16  ;;  %s3154_s30 = scalar_lea.vmem %s98_s14, 32 }
  0x97   :  { %p3151_p11 = scmp.ne.s32.totalorder %s98_s14, %s3150_s4  ;;  %p3155_p12 = scmp.lt.s32.totalorder %s98_s14, %s98_s14 }
  0x98   :  { %p3156_p13 = scmp.lt.s32.totalorder %s3154_s30, %s3150_s4 }
  0x9a   :  { %p3157_p0 = por %p3156_p13, %p3155_p12 }
  0x9c   :  { %p3158_p1 = pnand %p3157_p0, %p3151_p11 }
  0x9e   :  { %3161 = shalt.err (!%p3158_p1)
}
  0x9f   :  { %100 = dma.hbm_to_vmem [thread:$0]  %s3937_s6, 16, %s98_s14, [#allocation12]  }
  0xa0   :  { %s3162_s27 = scalar_lea.hbm %s3939_s8, 256 }
  0xa1   :  { %p3163_p2 = scmp.ne.s32.totalorder %s3939_s8, %s3162_s27  ;;  %p3166_p3 = scmp.lt.u32.totalorder %s3162_s27, %s3939_s8 }
  0xa3   :  { %p3168_p4 = pnand %p3166_p3, %p3163_p2 }
  0xa5   :  { %3171 = shalt.err (!%p3168_p4)
}
  0xa6   :  { %s3172_s15 = scalar_lea.vmem %s3485_s17, 256  ;;  %p3177_p6 = scmp.lt.s32.totalorder %s3485_s17, %s3485_s17 }
  0xa7   :  { %p3173_p5 = scmp.ne.s32.totalorder %s3485_s17, %s3172_s15  ;;  %p3178_p7 = scmp.lt.s32.totalorder %s3172_s15, %s3172_s15 }
  0xa9   :  { %p3179_p8 = por %p3178_p7, %p3177_p6 }
  0xab   :  { %p3180_p9 = pnand %p3179_p8, %p3173_p5 }
  0xad   :  { %3183 = shalt.err (!%p3180_p9)
}
  0xae   :  { %122 = dma.hbm_to_vmem [thread:$0]  %s3939_s8, 256, %s3485_s17, [#allocation15], %s3268_s1, %s3268_s1, %s3269_s22  }
  0xaf   :  { %s3280_s16 = smov [#allocation19]   ;;  %s3281_s19 = smov [#allocation20]  }
  0xb0   :  { %s138_s18 = sshll.u32 %s3280_s16, 4  ;;  %s151_s0 = sshll.u32 %s3281_s19, 4  ;;  %s139_s18 = int_to_ptr.vmem [resolvable:$true] %s138_s18  ;;  %s152_s0 = int_to_ptr.vmem [resolvable:$true] %s151_s0 }
  0xb1   :  { %s3184_s13 = scalar_lea.hbm %s3941_s10, 1024 }
  0xb2   :  { %p3185_p10 = scmp.ne.s32.totalorder %s3941_s10, %s3184_s13  ;;  %p3188_p11 = scmp.lt.u32.totalorder %s3184_s13, %s3941_s10 }
  0xb4   :  { %p3190_p12 = pnand %p3188_p11, %p3185_p10 }
  0xb6   :  { %3193 = shalt.err (!%p3190_p12)
}
  0xb7   :  { %s3194_s8 = scalar_lea.vmem %s139_s18, 1024  ;;  %p3199_p0 = scmp.lt.s32.totalorder %s139_s18, %s139_s18 }
  0xb8   :  { %p3195_p13 = scmp.ne.s32.totalorder %s139_s18, %s3194_s8  ;;  %p3200_p1 = scmp.lt.s32.totalorder %s3194_s8, %s3194_s8 }
  0xba   :  { %p3201_p2 = por %p3200_p1, %p3199_p0 }
  0xbc   :  { %p3202_p3 = pnand %p3201_p2, %p3195_p13 }
  0xbe   :  { %3205 = shalt.err (!%p3202_p3)
}
  0xbf   :  { %144 = dma.hbm_to_vmem [thread:$0]  %s3941_s10, 1024, %s139_s18, [#allocation18], %s3268_s1, %s3268_s1, %s3269_s22  }
  0xc0   :  { %s3206_s27 = scalar_lea.hbm %s3942_s11, 16 }
  0xc1   :  { %p3207_p4 = scmp.ne.s32.totalorder %s3942_s11, %s3206_s27  ;;  %p3210_p5 = scmp.lt.u32.totalorder %s3206_s27, %s3942_s11 }
  0xc3   :  { %p3212_p6 = pnand %p3210_p5, %p3207_p4 }
  0xc5   :  { %3215 = shalt.err (!%p3212_p6)
}
  0xc6   :  { %s3216_s15 = scalar_lea.vmem %s152_s0, 16  ;;  %s3220_s6 = scalar_lea.vmem %s152_s0, 32 }
  0xc7   :  { %p3217_p7 = scmp.ne.s32.totalorder %s152_s0, %s3216_s15  ;;  %p3221_p8 = scmp.lt.s32.totalorder %s152_s0, %s152_s0 }
  0xc8   :  { %p3222_p9 = scmp.lt.s32.totalorder %s3220_s6, %s3216_s15 }
  0xca   :  { %p3223_p10 = por %p3222_p9, %p3221_p8 }
  0xcc   :  { %p3224_p11 = pnand %p3223_p10, %p3217_p7 }
  0xce   :  { %3227 = shalt.err (!%p3224_p11)
}
  0xcf   :  { %154 = dma.hbm_to_vmem [thread:$0]  %s3942_s11, 16, %s152_s0, [#allocation21]  }
  0xd0   :  { %3250 = dma.done.wait [#allocation3], 256  }
  0xd1   :  { %3251 = vsyncadd [#allocation3], 4294967040 }
  0xd2   :  { %3252 = dma.done.wait [#allocation6], 32  }
  0xd3   :  { %3253 = vsyncadd [#allocation6], 4294967264 }
  0xd4   :  { %3254 = dma.done.wait [#allocation9], 512  }
  0xd5   :  { %3255 = vsyncadd [#allocation9], 4294966784 }
  0xd6   :  { %3256 = dma.done.wait [#allocation12], 32  }
  0xd7   :  { %3257 = vsyncadd [#allocation12], 4294967264 }
  0xd8   :  { %3258 = dma.done.wait [#allocation15], 272  }
  0xd9   :  { %3259 = vsyncadd [#allocation15], 4294967024 }
  0xda   :  { %3260 = dma.done.wait [#allocation18], 1040  }
  0xdb   :  { %3261 = vsyncadd [#allocation18], 4294966256 }
  0xdc   :  { %3262 = dma.done.wait [#allocation21], 16  }
  0xdd   :  { %3263 = vsyncadd [#allocation21], 4294967280  ;;  %vm196_vm0 = vcmask 261120   ;;  %v192_v0 = vld [vmem:[#allocation2] sm:$0xff]  ;;  %v193_v1 = vld [vmem:[#allocation2 + $0x8] sm:$0xff]  ;;  %v3282_v15 = vmov 0.0   ;;  %v338_v47 = vlaneseq }
  0xde   :  { %v197_v2 = vsel %vm196_vm0, %v192_v0, 0.0  ;;  %v200_v3 = vsel %vm196_vm0, %v193_v1, 0.0  ;;  %v2908_v14 = vld [vmem:[#allocation8] sm:$0xff]   ;;  %2725 = vmatprep.subr.bf16.mxu0 %v3282_v15  ;;  %2745 = vmatprep.subr.bf16.mxu1 %v3282_v15  ;;  %v2909_v16 = vld [vmem:[#allocation8 + $0x8] sm:$0xff]   ;;  %vm3283_vm1 = vmmov 0   ;;  %s3284_s11 = smov 112  }
  0xdf   :  { %198 = vadd.xlane.f32.xlu0 %v197_v2  ;;  %2726 = vmatpush3.bf16.msra.mxu0 %v2908_v14  ;;  %v2619_v25 = vld [vmem:[#allocation5] ss:$0 sm:$0xff]  ;;  %v2620_v29 = vld [vmem:[#allocation7] ss:$0 sm:$0xff]  ;;  %s3285_s14 = smov 120   ;;  %s3286_s16 = smov 104  }
  0xe0   :  { %2729 = vmatprep.mubr.msk.bf16.mxu0 %vm3283_vm1, %v3282_v15  ;;  %2727 = vmatprep.subr.bf16.mxu0 %v3282_v15  ;;  %s3287_s18 = smov 96   ;;  %v3288_v45 = vmov 1983009808   ;;  %v339_v50 = vshrl.u32 %v338_v47, 7  ;;  %v3289_v51 = vmov 1934713408  }
  0xe1   :  { %2747 = vmatprep.mubr.msk.bf16.mxu1 %vm3283_vm1, %v3282_v15  ;;  %v336_v46 = vunpack.c.l.s4 %v3288_v45  ;;  %v367_v52 = vunpack.c.l.s4 %v3289_v51  ;;  %v3290_v54 = vmov 0   ;;  %vm1157_vm2 = vcmask 64512   ;;  %s3292_s19 = smov 24   ;;  %s3293_s0 = smov [#allocation22]  }
  0xe2   :  { %v3583_v55 = vpack.i.b16 %v3290_v54, %v3290_v54  ;;  %vm1625_vm3 = vcmask 1043456   ;;  %vm2289_vm4 = vcmask 130048   ;;  %vm2292_vm5 = vcmask 195584   ;;  %s2601_s3 = sshll.u32 %s3293_s0, 4  ;;  %s2602_s3 = int_to_ptr.vmem [resolvable:$true] %s2601_s3 }
  0xe3   :  { %201 = vadd.xlane.f32.xlu0 %v200_v3  ;;  %2728 = vmatpush3.bf16.msra.mxu0 %v2909_v16  ;;  %v337_v49 = vunpack.c.0.s8 %v336_v46  ;;  %v368_v62 = vunpack.c.0.s8 %v367_v52  ;;  %s3228_s5 = scalar_lea.vmem %s2602_s3, 256  ;;  %p3233_p13 = scmp.lt.s32.totalorder %s2602_s3, %s2602_s3 }
  0xe4   :  { %2733 = vmatprep.subr.bf16.mxu0 %v3282_v15  ;;  %p3229_p12 = scmp.ne.s32.totalorder %s2602_s3, %s3228_s5  ;;  %p3234_p0 = scmp.lt.s32.totalorder %s3228_s5, %s3228_s5 }
  0xe5   :  { %v3585_v60 = vsub.s32 %v337_v49, %v339_v50 }
  0xe6   :  { %p3235_p1 = por %p3234_p0, %p3233_p13 }
  0xe8   :  { %p3236_p2 = pnand %p3235_p1, %p3229_p12 }
 0x16c   :  { %v199_v4 = vpop.xlane.xlu0 %198 }
 0x16d   :  { %v204_v5 = vmul.f32 0.03125, %v199_v4 }
 0x16f   :  { %v206_v6 = vsub.f32 %v192_v0, %v204_v5 }
 0x170   :  { %v202_v7 = vpop.xlane.xlu0 %201 }
 0x171   :  { %v205_v8 = vmul.f32 0.03125, %v202_v7  ;;  %v208_v9 = vmul.f32 %v206_v6, %v206_v6  ;;  %v3590_v7 = vsub.s32 %v368_v62, %v339_v50 }
 0x173   :  { %v207_v10 = vsub.f32 %v193_v1, %v205_v8  ;;  %v210_v11 = vsel %vm196_vm0, %v208_v9, 0.0 }
 0x174   :  { %211 = vadd.xlane.f32.xlu1 %v210_v11 }
 0x175   :  { %v209_v12 = vmul.f32 %v207_v10, %v207_v10 }
 0x177   :  { %v213_v13 = vsel %vm196_vm0, %v209_v12, 0.0 }
 0x178   :  { %214 = vadd.xlane.f32.xlu1 %v213_v13 }
 0x201   :  { %v212_v17 = vpop.xlane.xlu1 %211 }
 0x202   :  { %v216_v18 = vmul.f32 0.03125, %v212_v17 }
 0x204   :  { %v218_v19 = vadd.f32 1e-05, %v216_v18 }
 0x205   :  { %v215_v20 = vpop.xlane.xlu1 %214 }
 0x206   :  { %2922 = vrsqrt.f32 %v218_v19  ;;  %v217_v21 = vmul.f32 0.03125, %v215_v20 }
 0x208   :  { %v219_v22 = vadd.f32 1e-05, %v217_v21 }
 0x20a   :  { %2924 = vrsqrt.f32 %v219_v22 }
 0x210   :  { %v2923_v23 = vpop.eup %2922 }
 0x211   :  { %v222_v24 = vmul.f32 %v2923_v23, %v206_v6 }
 0x213   :  { %v230_v28 = vmul.f32 %v2619_v25, %v222_v24 }
 0x214   :  { %v2925_v26 = vpop.eup %2924 }
 0x215   :  { %v223_v27 = vmul.f32 %v2925_v26, %v207_v10  ;;  %v238_v31 = vadd.f32 %v2620_v29, %v230_v28 }
 0x217   :  { %v231_v30 = vmul.f32 %v2619_v25, %v223_v27 }
 0x219   :  { %v239_v32 = vadd.f32 %v2620_v29, %v231_v30 }
 0x21b   :  { %v240_v33 = vpack.c.bf16 %v239_v32, %v238_v31 }
 0x21d   :  { %2730 = vmatmul.mubr.msk.bf16.vlgmr.msra.gmra.mrb[0].mxu0 %vm196_vm0, %v240_v33 }
 0x21e   :  { %2735 = vmatprep.mubr.msk.bf16.mxu0 %vm3283_vm1, %v3282_v15 }
 0x2f0   :  { %v294_v34 = vpop.f32.mrb[0].mxu0 }
 0x2f1   :  { %v2731_v35 = vpop.f32.mrb[1].mxu0  ;;  %v301_v37 = vmul.f32 0.17677669, %v294_v34 }
 0x2f2   :  { %v297_v36 = vpop.f32.mrb[2].mxu0 }
 0x2f3   :  { %v302_v38 = vmul.f32 0.17677669, %v297_v36  ;;  %v3561_v39 = vpack.c.bf16 %v297_v36, %v294_v34  ;;  %v2732_v40 = vpop.f32.mrb[3].mxu0 }
 0x2f5   :  { %v3563_v41 = vpack.c.bf16 %v302_v38, %v301_v37  ;;  %593 = vrot.lane.b32.xlu1 %v3561_v39, %s3284_s11  ;;  %591 = vrot.lane.b32.xlu0 %v3561_v39, %s3285_s14 }
 0x2f7   :  { %v316_v12 = vshrl.u32 %v3563_v41, 16 }
 0x2f9   :  { %595 = vrot.lane.b32.xlu1 %v3561_v39, %s3286_s16 }
 0x2fd   :  { %597 = vrot.lane.b32.xlu1 %v3561_v39, %s3287_s18 }
 0x367   :  { %v3569_v42 = vpop.permute.xlu1 %593  ;;  %v3571_v43 = vpop.permute.xlu0 %591 }
 0x368   :  { %601 = vrot.lane.b32.xlu1 %v3569_v42, %s3287_s18  ;;  %599 = vrot.lane.b32.xlu0 %v3571_v43, %s3287_s18 }
 0x36b   :  { %v3575_v44 = vpop.permute.xlu1 %595 }
 0x36c   :  { %603 = vrot.lane.b32.xlu0 %v3575_v44, %s3287_s18  ;;  %306 = vrot.lane.b32.xlu1 %v3563_v41, %s3285_s14 }
 0x36f   :  { %v598_v48 = vpop.permute.xlu1 %597 }
 0x370   :  { %308 = vrot.lane.b32.xlu0 %v3563_v41, %s3284_s11  ;;  %310 = vrot.lane.b32.xlu1 %v3563_v41, %s3286_s16  ;;  %v609_v57 = vshrl.u32 %v598_v48, 16 }
 0x3da   :  { %v602_v53 = vpop.permute.xlu1 %601  ;;  %v600_v56 = vpop.permute.xlu0 %599 }
 0x3db   :  { %v607_v58 = vpack.i.b16 %v600_v56, %v598_v48  ;;  %v610_v59 = vshrl.u32 %v600_v56, 16  ;;  %v617_v3 = vshrl.u32 %v602_v53, 16 }
 0x3dd   :  { %v611_v61 = vpack.i.b16 %v610_v59, %v609_v57  ;;  %v621_v63 = vcombine.high %v607_v58, %v3583_v55  ;;  %v628_v6 = vrot.slane %v607_v58, %v3585_v60 }
 0x3de   :  { %v604_v0 = vpop.permute.xlu0 %603  ;;  %v307_v2 = vpop.permute.xlu1 %306 }
 0x3df   :  { %v615_v1 = vpack.i.b16 %v604_v0, %v602_v53  ;;  %v687_v4 = vcombine.high %v611_v61, %v3583_v55  ;;  %v618_v5 = vshrl.u32 %v604_v0, 16  ;;  %v635_v10 = vrot.slane %v621_v63, %v3585_v60 }
 0x3e0   :  { %v317_v13 = vshrl.u32 %v307_v2, 16  ;;  %v694_v14 = vrot.slane %v611_v61, %v3585_v60  ;;  %v314_v22 = vpack.i.b16 %v307_v2, %v3563_v41 }
 0x3e1   :  { %v636_v8 = vcombine.high %v615_v1, %v3583_v55  ;;  %v643_v9 = vrot.slane %v615_v1, %v3585_v60  ;;  %v619_v11 = vpack.i.b16 %v618_v5, %v617_v3  ;;  %v701_v19 = vrot.slane %v687_v4, %v3585_v60 }
 0x3e2   :  { %v318_v30 = vpack.i.b16 %v317_v13, %v316_v12  ;;  %v309_v40 = vpop.permute.xlu0 %308  ;;  %v311_v41 = vpop.permute.xlu1 %310  ;;  %v334_v47 = vcombine.high %v314_v22, %v3583_v55  ;;  %v341_v52 = vrot.slane %v314_v22, %v3585_v60 }
 0x3e3   :  { %v650_v16 = vrot.slane %v636_v8, %v3585_v60  ;;  %v651_v17 = vcombine.low %v628_v6, %v643_v9  ;;  %v652_v18 = vcombine.high %v628_v6, %v643_v9  ;;  %v702_v20 = vcombine.high %v619_v11, %v3583_v55 }
 0x3e4   :  { %v709_v21 = vrot.slane %v619_v11, %v3585_v60  ;;  %v400_v53 = vcombine.high %v318_v30, %v3583_v55  ;;  %v324_v56 = vshrl.u32 %v309_v40, 16  ;;  %v322_v57 = vpack.i.b16 %v311_v41, %v309_v40 }
 0x3e5   :  { %v659_v23 = vrot.slane %v651_v17, %v3590_v7  ;;  %v666_v24 = vrot.slane %v652_v18, %v3590_v7  ;;  %v667_v25 = vcombine.low %v635_v10, %v650_v16  ;;  %v668_v26 = vcombine.high %v635_v10, %v650_v16 }
 0x3e6   :  { %v716_v27 = vrot.slane %v702_v20, %v3585_v60  ;;  %v717_v28 = vcombine.low %v694_v14, %v709_v21  ;;  %v718_v29 = vcombine.high %v694_v14, %v709_v21  ;;  %v325_v63 = vshrl.u32 %v311_v41, 16 }
 0x3e7   :  { %v675_v31 = vrot.slane %v667_v25, %v3590_v7  ;;  %v682_v32 = vrot.slane %v668_v26, %v3590_v7  ;;  %v753_v33 = vcombine.low %v659_v23, %v666_v24  ;;  %v2628_v34 = vcombine.high %v659_v23, %v666_v24 }
 0x3e8   :  { %v725_v35 = vrot.slane %v717_v28, %v3590_v7  ;;  %v732_v36 = vrot.slane %v718_v29, %v3590_v7  ;;  %v733_v37 = vcombine.low %v701_v19, %v716_v27  ;;  %v734_v38 = vcombine.high %v701_v19, %v716_v27 }
 0x3e9   :  { %v760_v45 = vrot.slane %v753_v33, %v3585_v60  ;;  %v768_v46 = vrot.slane %v2628_v34, %v3585_v60  ;;  %v803_v61 = vcombine.low %v675_v31, %v682_v32  ;;  %v2630_v62 = vcombine.high %v675_v31, %v682_v32 }
 0x3ea   :  { %v741_v48 = vrot.slane %v733_v37, %v3590_v7  ;;  %v748_v49 = vrot.slane %v734_v38, %v3590_v7  ;;  %v778_v50 = vcombine.low %v725_v35, %v732_v36  ;;  %v2629_v51 = vcombine.high %v725_v35, %v732_v36 }
 0x3eb   :  { %v349_v0 = vcombine.high %v322_v57, %v3583_v55  ;;  %v356_v1 = vrot.slane %v322_v57, %v3585_v60  ;;  %v769_v2 = vcombine.low %v760_v45, %v768_v46  ;;  %v348_v4 = vrot.slane %v334_v47, %v3585_v60 }
 0x3ec   :  { %v785_v58 = vrot.slane %v778_v50, %v3585_v60  ;;  %v793_v59 = vrot.slane %v2629_v51, %v3585_v60  ;;  %v828_v3 = vcombine.low %v741_v48, %v748_v49  ;;  %v407_v5 = vrot.slane %v318_v30, %v3585_v60 }
 0x3ed   :  { %v326_v8 = vpack.i.b16 %v325_v63, %v324_v56  ;;  %v363_v9 = vrot.slane %v349_v0, %v3585_v60  ;;  %v364_v10 = vcombine.low %v341_v52, %v356_v1  ;;  %v365_v11 = vcombine.high %v341_v52, %v356_v1 }
 0x3ee   :  { %v794_v6 = vcombine.low %v785_v58, %v793_v59  ;;  %v810_v12 = vrot.slane %v803_v61, %v3585_v60  ;;  %v818_v13 = vrot.slane %v2630_v62, %v3585_v60  ;;  %v776_v14 = vrot.slane %v769_v2, %v3590_v7 }
 0x3ef   :  { %v2631_v17 = vcombine.high %v741_v48, %v748_v49  ;;  %v414_v18 = vrot.slane %v400_v53, %v3585_v60  ;;  %v372_v19 = vrot.slane %v364_v10, %v3590_v7  ;;  %v379_v20 = vrot.slane %v365_v11, %v3590_v7 }
 0x3f0   :  { %v801_v16 = vrot.slane %v794_v6, %v3590_v7  ;;  %v415_v21 = vcombine.high %v326_v8, %v3583_v55  ;;  %v422_v22 = vrot.slane %v326_v8, %v3585_v60  ;;  %v835_v24 = vrot.slane %v828_v3, %v3585_v60 }
 0x3f1   :  { %v380_v25 = vcombine.low %v348_v4, %v363_v9  ;;  %v381_v26 = vcombine.high %v348_v4, %v363_v9  ;;  %v466_v27 = vcombine.low %v372_v19, %v379_v20  ;;  %v2624_v28 = vcombine.high %v372_v19, %v379_v20 }
 0x3f2   :  { %v855_v23 = vpack.i.b16 %v801_v16, %v776_v14  ;;  %v429_v29 = vrot.slane %v415_v21, %v3585_v60  ;;  %v430_v30 = vcombine.low %v407_v5, %v422_v22  ;;  %v431_v31 = vcombine.high %v407_v5, %v422_v22 }
 0x3f3   :  { %v473_v33 = vrot.slane %v466_v27, %v3585_v60  ;;  %v481_v34 = vrot.slane %v2624_v28, %v3585_v60  ;;  %v777_v35 = vcombine.high %v776_v14, %v3290_v54  ;;  %v843_v36 = vrot.slane %v2631_v17, %v3585_v60 }
 0x3f4   :  { %v1162_v32 = vsel %vm1157_vm2, %v855_v23, 0  ;;  %v438_v37 = vrot.slane %v430_v30, %v3590_v7  ;;  %v445_v38 = vrot.slane %v431_v31, %v3590_v7  ;;  %v446_v40 = vcombine.low %v414_v18, %v429_v29 }
 0x3f5   :  { %2734 = vmatpush3.bf16.xpose.msra.mxu0 %v1162_v32  ;;  %v447_v41 = vcombine.high %v414_v18, %v429_v29  ;;  %v388_v45 = vrot.slane %v380_v25, %v3590_v7  ;;  %v395_v46 = vrot.slane %v381_v26, %v3590_v7  ;;  %v482_v47 = vcombine.low %v473_v33, %v481_v34 }
 0x3f6   :  { %2739 = vmatprep.subr.bf16.mxu0 %v3282_v15  ;;  %v802_v48 = vcombine.high %v801_v16, %v3290_v54  ;;  %v454_v49 = vrot.slane %v446_v40, %v3590_v7  ;;  %v491_v51 = vcombine.low %v438_v37, %v445_v38  ;;  %v2625_v52 = vcombine.high %v438_v37, %v445_v38 }
 0x3f7   :  { %v461_v50 = vrot.slane %v447_v41, %v3590_v7  ;;  %v819_v56 = vcombine.low %v810_v12, %v818_v13  ;;  %v844_v57 = vcombine.low %v835_v24, %v843_v36  ;;  %v516_v63 = vcombine.low %v388_v45, %v395_v46 }
 0x3f8   :  { %v861_v53 = vpack.i.b16 %v802_v48, %v777_v35  ;;  %v498_v58 = vrot.slane %v491_v51, %v3585_v60  ;;  %v506_v59 = vrot.slane %v2625_v52, %v3585_v60  ;;  %v2626_v0 = vcombine.high %v388_v45, %v395_v46 }
 0x3f9   :  { %v541_v61 = vcombine.low %v454_v49, %v461_v50  ;;  %v2627_v62 = vcombine.high %v454_v49, %v461_v50  ;;  %v857_v2 = vshrl.u32 %v801_v16, 16  ;;  %v489_v3 = vrot.slane %v482_v47, %v3590_v7 }
 0x3fa   :  { %v1254_v1 = vsel %vm1157_vm2, %v861_v53, 0  ;;  %v507_v4 = vcombine.low %v498_v58, %v506_v59  ;;  %v856_v5 = vshrl.u32 %v776_v14, 16  ;;  %v826_v6 = vrot.slane %v819_v56, %v3590_v7 }
 0x3fb   :  { %2746 = vmatpush3.bf16.xpose.msra.mxu1 %v1254_v1  ;;  %v851_v8 = vrot.slane %v844_v57, %v3590_v7  ;;  %v548_v9 = vrot.slane %v541_v61, %v3585_v60  ;;  %v556_v10 = vrot.slane %v2627_v62, %v3585_v60  ;;  %v523_v13 = vrot.slane %v516_v63, %v3585_v60 }
 0x3fc   :  { %2757 = vmatprep.subr.bf16.mxu1 %v3282_v15  ;;  %v514_v11 = vrot.slane %v507_v4, %v3590_v7  ;;  %v858_v12 = vpack.i.b16 %v857_v2, %v856_v5  ;;  %v531_v16 = vrot.slane %v2626_v0, %v3585_v60  ;;  %v490_v14 = vcombine.high %v489_v3, %v3290_v54 }
 0x3fd   :  { %v867_v19 = vpack.i.b16 %v851_v8, %v826_v6  ;;  %v557_v20 = vcombine.low %v548_v9, %v556_v10  ;;  %v863_v21 = vshrl.u32 %v802_v48, 16  ;;  %v862_v25 = vshrl.u32 %v777_v35, 16 }
 0x3fe   :  { %v568_v17 = vpack.i.b16 %v514_v11, %v489_v3  ;;  %v515_v18 = vcombine.high %v514_v11, %v3290_v54  ;;  %v1208_v22 = vsel %vm1157_vm2, %v858_v12, 0  ;;  %v532_v24 = vcombine.low %v523_v13, %v531_v16 }
 0x3ff   :  { %v1346_v26 = vsel %vm1157_vm2, %v867_v19, 0  ;;  %v570_v27 = vshrl.u32 %v514_v11, 16  ;;  %v852_v28 = vcombine.high %v851_v8, %v3290_v54  ;;  %v569_v29 = vshrl.u32 %v489_v3, 16 }
 0x400   :  { %2736 = vmatmul.mubr.msk.bf16.vlgmr.msra.gmra.mrb[4].mxu0 %vm1157_vm2, %v568_v17  ;;  %v574_v23 = vpack.i.b16 %v515_v18, %v490_v14  ;;  %v864_v30 = vpack.i.b16 %v863_v21, %v862_v25  ;;  %v564_v31 = vrot.slane %v557_v20, %v3590_v7  ;;  %v827_v32 = vcombine.high %v826_v6, %v3290_v54 }
 0x401   :  { %2740 = vmatpush3.bf16.xpose.msra.mxu0 %v1208_v22  ;;  %2741 = vmatprep.mubr.msk.bf16.mxu0 %vm3283_vm1, %v3282_v15  ;;  %v571_v33 = vpack.i.b16 %v570_v27, %v569_v29  ;;  %v539_v34 = vrot.slane %v532_v24, %v3590_v7  ;;  %v869_v38 = vshrl.u32 %v851_v8, 16  ;;  %v576_v40 = vshrl.u32 %v515_v18, 16 }
 0x402   :  { %2748 = vmatmul.mubr.msk.bf16.vlgmr.msra.gmra.mrb[0].mxu1 %vm1157_vm2, %v574_v23  ;;  %2751 = vmatprep.subr.bf16.mxu0 %v3282_v15  ;;  %v873_v35 = vpack.i.b16 %v852_v28, %v827_v32  ;;  %v1300_v36 = vsel %vm1157_vm2, %v864_v30, 0  ;;  %v868_v45 = vshrl.u32 %v826_v6, 16  ;;  %v575_v46 = vshrl.u32 %v490_v14, 16 }
 0x403   :  { %2758 = vmatpush3.bf16.xpose.msra.mxu1 %v1346_v26  ;;  %2759 = vmatprep.mubr.msk.bf16.mxu1 %vm3283_vm1, %v3282_v15  ;;  %v580_v37 = vpack.i.b16 %v564_v31, %v539_v34  ;;  %v565_v48 = vcombine.high %v564_v31, %v3290_v54  ;;  %v540_v50 = vcombine.high %v539_v34, %v3290_v54  ;;  %v875_v53 = vshrl.u32 %v852_v28, 16 }
 0x404   :  { %2769 = vmatprep.subr.bf16.mxu1 %v3282_v15  ;;  %v1438_v41 = vsel %vm1157_vm2, %v873_v35, 0  ;;  %v870_v47 = vpack.i.b16 %v869_v38, %v868_v45  ;;  %v577_v49 = vpack.i.b16 %v576_v40, %v575_v46  ;;  %v582_v56 = vshrl.u32 %v564_v31, 16 }
 0x405   :  { %v586_v52 = vpack.i.b16 %v565_v48, %v540_v50  ;;  %v874_v57 = vshrl.u32 %v827_v32, 16  ;;  %v581_v58 = vshrl.u32 %v539_v34, 16  ;;  %v588_v63 = vshrl.u32 %v565_v48, 16 }
 0x406   :  { %v1392_v51 = vsel %vm1157_vm2, %v870_v47, 0  ;;  %v587_v0 = vshrl.u32 %v540_v50, 16 }
 0x407   :  { %v876_v59 = vpack.i.b16 %v875_v53, %v874_v57  ;;  %v583_v61 = vpack.i.b16 %v582_v56, %v581_v58 }
 0x408   :  { %2742 = vmatmul.mubr.msk.bf16.vlgmr.msra.gmra.mrb[8].mxu0 %vm1157_vm2, %v571_v33  ;;  %v589_v1 = vpack.i.b16 %v588_v63, %v587_v0 }
 0x409   :  { %2752 = vmatpush3.bf16.xpose.msra.mxu0 %v1300_v36  ;;  %2753 = vmatprep.mubr.msk.bf16.mxu0 %vm3283_vm1, %v3282_v15  ;;  %v1484_v62 = vsel %vm1157_vm2, %v876_v59, 0 }
 0x40a   :  { %2760 = vmatmul.mubr.msk.bf16.vlgmr.msra.gmra.mrb[4].mxu1 %vm1157_vm2, %v580_v37  ;;  %2763 = vmatprep.subr.bf16.mxu0 %v3282_v15 }
 0x40b   :  { %2770 = vmatpush3.bf16.xpose.msra.mxu1 %v1438_v41  ;;  %2771 = vmatprep.mubr.msk.bf16.mxu1 %vm3283_vm1, %v3282_v15 }
 0x40c   :  { %2781 = vmatprep.subr.bf16.mxu1 %v3282_v15 }
 0x410   :  { %2754 = vmatmul.mubr.msk.bf16.vlgmr.msra.gmra.mrb[12].mxu0 %vm1157_vm2, %v577_v49 }
 0x411   :  { %2764 = vmatpush3.bf16.xpose.msra.mxu0 %v1392_v51  ;;  %2765 = vmatprep.mubr.msk.bf16.mxu0 %vm3283_vm1, %v3282_v15 }
 0x412   :  { %2772 = vmatmul.mubr.msk.bf16.vlgmr.msra.gmra.mrb[8].mxu1 %vm1157_vm2, %v586_v52  ;;  %2775 = vmatprep.subr.bf16.mxu0 %v3282_v15 }
 0x413   :  { %2783 = vmatprep.mubr.msk.bf16.mxu1 %vm3283_vm1, %v3282_v15 }
 0x418   :  { %2766 = vmatmul.mubr.msk.bf16.vlgmr.msra.gmra.mrb[16].mxu0 %vm1157_vm2, %v583_v61 }
 0x419   :  { %2776 = vmatpush3.bf16.xpose.msra.mxu0 %v1484_v62  ;;  %2777 = vmatprep.mubr.msk.bf16.mxu0 %vm3283_vm1, %v3282_v15 }
 0x41a   :  { %2787 = vmatprep.subr.bf16.mxu0 %v3282_v15 }
 0x420   :  { %2778 = vmatmul.mubr.msk.bf16.vlgmr.msra.gmra.mrb[20].mxu0 %vm1157_vm2, %v589_v1 }
 0x421   :  { %2789 = vmatprep.mubr.msk.bf16.mxu0 %vm3283_vm1, %v3282_v15 }
 0x4d3   :  { %v1198_v2 = vpop.f32.mrb[4].mxu0 }
 0x4d4   :  { %v2737_v3 = vpop.f32.mrb[5].mxu0  ;;  %v1526_v4 = vsel %vm1157_vm2, %v1198_v2, -inf }
 0x4d5   :  { %v3704_v5 = vpop.f32.mrb[0].mxu1  ;;  %1527 = vmax.xlane.f32.xlu0 %v1526_v4  ;;  %v1201_v6 = vpop.f32.mrb[6].mxu0 }
 0x4d6   :  { %v2738_v8 = vpop.f32.mrb[7].mxu0  ;;  %v2749_v9 = vpop.f32.mrb[1].mxu1  ;;  %v1532_v12 = vsel %vm1157_vm2, %v3704_v5, -inf }
 0x4d7   :  { %v1293_v10 = vpop.f32.mrb[2].mxu1 }
 0x4d8   :  { %v2750_v11 = vpop.f32.mrb[3].mxu1 }
 0x4d9   :  { %1533 = vmax.xlane.f32.xlu0 %v1532_v12 }
 0x4db   :  { %v1244_v13 = vpop.f32.mrb[8].mxu0 }
 0x4dc   :  { %v2743_v16 = vpop.f32.mrb[9].mxu0  ;;  %v1529_v17 = vsel %vm1157_vm2, %v1244_v13, -inf }
 0x4dd   :  { %v1382_v14 = vpop.f32.mrb[4].mxu1  ;;  %1530 = vmax.xlane.f32.xlu1 %v1529_v17  ;;  %v1247_v18 = vpop.f32.mrb[10].mxu0 }
 0x4de   :  { %v2744_v19 = vpop.f32.mrb[11].mxu0  ;;  %v2761_v20 = vpop.f32.mrb[5].mxu1  ;;  %v1538_v32 = vsel %vm1157_vm2, %v1382_v14, -inf }
 0x4df   :  { %v1385_v21 = vpop.f32.mrb[6].mxu1 }
 0x4e0   :  { %v2762_v22 = vpop.f32.mrb[7].mxu1 }
 0x4e3   :  { %v1336_v23 = vpop.f32.mrb[12].mxu0 }
 0x4e4   :  { %v2755_v24 = vpop.f32.mrb[13].mxu0  ;;  %v1535_v25 = vsel %vm1157_vm2, %v1336_v23, -inf }
 0x4e5   :  { %v1474_v26 = vpop.f32.mrb[8].mxu1  ;;  %1536 = vmax.xlane.f32.xlu0 %v1535_v25  ;;  %v1339_v27 = vpop.f32.mrb[14].mxu0 }
 0x4e6   :  { %v2756_v28 = vpop.f32.mrb[15].mxu0  ;;  %v2773_v29 = vpop.f32.mrb[9].mxu1  ;;  %v1544_v35 = vsel %vm1157_vm2, %v1474_v26, -inf }
 0x4e7   :  { %v1477_v30 = vpop.f32.mrb[10].mxu1 }
 0x4e8   :  { %v2774_v31 = vpop.f32.mrb[11].mxu1 }
 0x4e9   :  { %1539 = vmax.xlane.f32.xlu0 %v1538_v32 }
 0x4eb   :  { %v1428_v33 = vpop.f32.mrb[16].mxu0 }
 0x4ec   :  { %v2767_v34 = vpop.f32.mrb[17].mxu0  ;;  %v1541_v36 = vsel %vm1157_vm2, %v1428_v33, -inf }
 0x4ed   :  { %1545 = vmax.xlane.f32.xlu0 %v1544_v35  ;;  %1542 = vmax.xlane.f32.xlu1 %v1541_v36  ;;  %v1431_v37 = vpop.f32.mrb[18].mxu0 }
 0x4ee   :  { %v2768_v38 = vpop.f32.mrb[19].mxu0 }
 0x4f3   :  { %v1520_v40 = vpop.f32.mrb[20].mxu0 }
 0x4f4   :  { %v2779_v41 = vpop.f32.mrb[21].mxu0  ;;  %v1547_v45 = vsel %vm1157_vm2, %v1520_v40, -inf }
 0x4f5   :  { %1548 = vmax.xlane.f32.xlu1 %v1547_v45  ;;  %v1523_v46 = vpop.f32.mrb[22].mxu0 }
 0x4f6   :  { %v2780_v47 = vpop.f32.mrb[23].mxu0 }
 0x506   :  { %879 = vrot.lane.b32.xlu1 %v3571_v43, %s3268_s1 }
 0x50a   :  { %881 = vrot.lane.b32.xlu1 %v3569_v42, %s3268_s1 }
 0x562   :  { %v1528_v48 = vpop.xlane.xlu0 %1527 }
 0x563   :  { %v1550_v49 = vsub.f32 %v1198_v2, %v1528_v48 }
 0x565   :  { %v1558_v50 = vmul.f32 1.442695, %v1550_v49 }
 0x566   :  { %v1534_v42 = vpop.xlane.xlu0 %1533 }
 0x567   :  { %2926 = vpow2.f32 %v1558_v50  ;;  %v1552_v61 = vsub.f32 %v3704_v5, %v1534_v42 }
 0x569   :  { %v1562_v63 = vmul.f32 1.442695, %v1552_v61 }
 0x56a   :  { %v1531_v51 = vpop.xlane.xlu1 %1530 }
 0x56b   :  { %v1551_v52 = vsub.f32 %v1244_v13, %v1531_v51 }
 0x56d   :  { %v1560_v53 = vmul.f32 1.442695, %v1551_v52 }
 0x56f   :  { %2928 = vpow2.f32 %v1560_v53 }
 0x570   :  { %2930 = vpow2.f32 %v1562_v63 }
 0x571   :  { %v3718_v56 = vpop.eup %2926 }
 0x572   :  { %v1574_v57 = vsel %vm1157_vm2, %v3718_v56, 0.0  ;;  %v1537_v59 = vpop.xlane.xlu0 %1536 }
 0x573   :  { %1575 = vadd.xlane.f32.xlu0 %v1574_v57  ;;  %v1553_v2 = vsub.f32 %v1336_v23, %v1537_v59 }
 0x575   :  { %v1564_v9 = vmul.f32 1.442695, %v1553_v2 }
 0x576   :  { %v1540_v62 = vpop.xlane.xlu0 %1539 }
 0x577   :  { %v1554_v0 = vsub.f32 %v1382_v14, %v1540_v62 }
 0x579   :  { %v3722_v58 = vpop.eup %2928  ;;  %v1566_v3 = vmul.f32 1.442695, %v1554_v0 }
 0x57a   :  { %v1577_v43 = vsel %vm1157_vm2, %v3722_v58, 0.0  ;;  %v1543_v1 = vpop.xlane.xlu1 %1542  ;;  %v1546_v4 = vpop.xlane.xlu0 %1545 }
 0x57b   :  { %1578 = vadd.xlane.f32.xlu1 %v1577_v43  ;;  %v1555_v6 = vsub.f32 %v1428_v33, %v1543_v1  ;;  %v1556_v10 = vsub.f32 %v1474_v26, %v1546_v4  ;;  %2932 = vpow2.f32 %v1566_v3  ;;  %v3731_v5 = vpop.eup %2930 }
 0x57c   :  { %2934 = vpow2.f32 %v1564_v9  ;;  %v1580_v13 = vsel %vm1157_vm2, %v3731_v5, 0.0 }
 0x582   :  { %v1549_v8 = vpop.xlane.xlu1 %1548 }
 0x583   :  { %v1557_v11 = vsub.f32 %v1520_v40, %v1549_v8 }
 0x585   :  { %v1572_v12 = vmul.f32 1.442695, %v1557_v11  ;;  %v3735_v16 = vpop.eup %2932 }
 0x586   :  { %v3737_v17 = vpop.eup %2934  ;;  %v1586_v14 = vsel %vm1157_vm2, %v3735_v16, 0.0  ;;  %v880_v25 = vpop.permute.xlu1 %879 }
 0x587   :  { %v1583_v21 = vsel %vm1157_vm2, %v3737_v17, 0.0  ;;  %v890_v32 = vshrl.u32 %v880_v25, 16 }
 0x589   :  { %877 = vrot.lane.b32.xlu0 %v3561_v39, %s3268_s1  ;;  %v1568_v39 = vmul.f32 1.442695, %v1555_v6 }
 0x58a   :  { %v882_v27 = vpop.permute.xlu1 %881 }
 0x58b   :  { %2936 = vpow2.f32 %v1568_v39  ;;  %v897_v34 = vshrl.u32 %v882_v27, 16 }
 0x58c   :  { %883 = vrot.lane.b32.xlu1 %v3575_v44, %s3268_s1  ;;  %v1570_v44 = vmul.f32 1.442695, %v1556_v10  ;;  %s3291_s1 = smov 16  }
 0x58e   :  { %2938 = vpow2.f32 %v1570_v44 }
 0x58f   :  { %2940 = vpow2.f32 %v1572_v12 }
 0x595   :  { %v3741_v18 = vpop.eup %2936 }
 0x596   :  { %v1589_v20 = vsel %vm1157_vm2, %v3741_v18, 0.0 }
 0x598   :  { %v3743_v19 = vpop.eup %2938 }
 0x599   :  { %v3749_v22 = vpop.eup %2940  ;;  %v1592_v23 = vsel %vm1157_vm2, %v3743_v19, 0.0 }
 0x59a   :  { %v1595_v24 = vsel %vm1157_vm2, %v3749_v22, 0.0 }
 0x5a8   :  { %1581 = vadd.xlane.f32.xlu0 %v1580_v13 }
 0x5ac   :  { %1587 = vadd.xlane.f32.xlu0 %v1586_v14 }
 0x5b0   :  { %1590 = vadd.xlane.f32.xlu0 %v1589_v20  ;;  %1584 = vadd.xlane.f32.xlu1 %v1583_v21 }
 0x5b4   :  { %1593 = vadd.xlane.f32.xlu0 %v1592_v23  ;;  %1596 = vadd.xlane.f32.xlu1 %v1595_v24 }
 0x600   :  { %v1576_v26 = vpop.xlane.xlu0 %1575 }
 0x601   :  { %2942 = vrcp.f32 %v1576_v26 }
 0x604   :  { %v878_v28 = vpop.permute.xlu0 %877 }
 0x605   :  { %v889_v30 = vshrl.u32 %v878_v28, 16  ;;  %v3755_v31 = vpack.i.b16 %v880_v25, %v878_v28 }
 0x607   :  { %v891_v37 = vpack.i.b16 %v890_v32, %v889_v30  ;;  %v908_v38 = vrot.slane %v3755_v31, %v3585_v60 }
 0x608   :  { %v1579_v29 = vpop.xlane.xlu1 %1578 }
 0x609   :  { %v974_v47 = vrot.slane %v891_v37, %v3585_v60  ;;  %2944 = vrcp.f32 %v1579_v29 }
 0x60b   :  { %v2943_v4 = vpop.eup %2942 }
 0x60c   :  { %v884_v33 = vpop.permute.xlu1 %883  ;;  %v1606_v39 = vmul.f32 %v2943_v4, %v3718_v56 }
 0x60d   :  { %v895_v35 = vpack.i.b16 %v884_v33, %v882_v27  ;;  %v898_v36 = vshrl.u32 %v884_v33, 16  ;;  %v967_v27 = vcombine.high %v891_v37, %v3583_v55 }
 0x60e   :  { %v1614_v29 = vpack.c.bf16 %v1606_v39, %v1606_v39 }
 0x60f   :  { %v899_v40 = vpack.i.b16 %v898_v36, %v897_v34  ;;  %v923_v41 = vrot.slane %v895_v35, %v3585_v60  ;;  %v916_v56 = vcombine.high %v895_v35, %v3583_v55  ;;  %v981_v35 = vrot.slane %v967_v27, %v3585_v60 }
 0x611   :  { %v931_v45 = vcombine.low %v908_v38, %v923_v41  ;;  %v932_v46 = vcombine.high %v908_v38, %v923_v41  ;;  %v989_v48 = vrot.slane %v899_v40, %v3585_v60  ;;  %v982_v20 = vcombine.high %v899_v40, %v3583_v55 }
 0x612   :  { %v930_v36 = vrot.slane %v916_v56, %v3585_v60 }
 0x613   :  { %v939_v49 = vrot.slane %v931_v45, %v3590_v7  ;;  %v946_v50 = vrot.slane %v932_v46, %v3590_v7  ;;  %v997_v51 = vcombine.low %v974_v47, %v989_v48  ;;  %v998_v52 = vcombine.high %v974_v47, %v989_v48  ;;  %v2945_v9 = vpop.eup %2944 }
 0x614   :  { %v1607_v14 = vmul.f32 %v2945_v9, %v3722_v58  ;;  %v901_v58 = vcombine.high %v3755_v31, %v3583_v55  ;;  %v996_v32 = vrot.slane %v982_v20, %v3585_v60 }
 0x615   :  { %v1033_v53 = vcombine.low %v939_v49, %v946_v50  ;;  %v2632_v57 = vcombine.high %v939_v49, %v946_v50  ;;  %v1005_v43 = vrot.slane %v997_v51, %v3590_v7  ;;  %v1012_v42 = vrot.slane %v998_v52, %v3590_v7 }
 0x616   :  { %v1615_v34 = vpack.c.bf16 %v1607_v14, %v1607_v14  ;;  %v915_v31 = vrot.slane %v901_v58, %v3585_v60  ;;  %v1013_v37 = vcombine.low %v981_v35, %v996_v32  ;;  %v1014_v38 = vcombine.high %v981_v35, %v996_v32 }
 0x617   :  { %v1040_v59 = vrot.slane %v1033_v53, %v3585_v60  ;;  %v1048_v61 = vrot.slane %v2632_v57, %v3585_v60  ;;  %v1058_v62 = vcombine.low %v1005_v43, %v1012_v42  ;;  %v2633_v63 = vcombine.high %v1005_v43, %v1012_v42 }
 0x618   :  { %v947_v40 = vcombine.low %v915_v31, %v930_v36  ;;  %v948_v41 = vcombine.high %v915_v31, %v930_v36  ;;  %v1021_v45 = vrot.slane %v1013_v37, %v3590_v7  ;;  %v1028_v46 = vrot.slane %v1014_v38, %v3590_v7 }
 0x619   :  { %v1049_v0 = vcombine.low %v1040_v59, %v1048_v61  ;;  %v1065_v1 = vrot.slane %v1058_v62, %v3585_v60  ;;  %v1073_v2 = vrot.slane %v2633_v63, %v3585_v60 }
 0x61a   :  { %v955_v47 = vrot.slane %v947_v40, %v3590_v7  ;;  %v962_v48 = vrot.slane %v948_v41, %v3590_v7  ;;  %v1108_v49 = vcombine.low %v1021_v45, %v1028_v46  ;;  %v2635_v50 = vcombine.high %v1021_v45, %v1028_v46 }
 0x61b   :  { %v1056_v3 = vrot.slane %v1049_v0, %v3590_v7  ;;  %v1074_v6 = vcombine.low %v1065_v1, %v1073_v2 }
 0x61c   :  { %v1083_v51 = vcombine.low %v955_v47, %v962_v48  ;;  %v2634_v52 = vcombine.high %v955_v47, %v962_v48  ;;  %v1115_v57 = vrot.slane %v1108_v49, %v3585_v60  ;;  %v1123_v43 = vrot.slane %v2635_v50, %v3585_v60 }
 0x61d   :  { %v1057_v8 = vcombine.high %v1056_v3, %v3290_v54  ;;  %v1081_v10 = vrot.slane %v1074_v6, %v3590_v7  ;;  %v1136_v44 = vshrl.u32 %v1056_v3, 16 }
 0x61e   :  { %v1090_v42 = vrot.slane %v1083_v51, %v3585_v60  ;;  %v1098_v59 = vrot.slane %v2634_v52, %v3585_v60  ;;  %v1124_v62 = vcombine.low %v1115_v57, %v1123_v43 }
 0x61f   :  { %v1135_v11 = vpack.i.b16 %v1081_v10, %v1056_v3  ;;  %v1137_v12 = vshrl.u32 %v1081_v10, 16  ;;  %v1082_v13 = vcombine.high %v1081_v10, %v3290_v54  ;;  %v1142_v21 = vshrl.u32 %v1057_v8, 16 }
 0x620   :  { %v1099_v63 = vcombine.low %v1090_v42, %v1098_v59  ;;  %v1131_v2 = vrot.slane %v1124_v62, %v3590_v7 }
 0x621   :  { %v1627_v23 = vsel %vm1625_vm3, %v1135_v11, 0  ;;  %v1138_v24 = vpack.i.b16 %v1137_v12, %v1136_v44  ;;  %v1141_v25 = vpack.i.b16 %v1082_v13, %v1057_v8  ;;  %v1143_v26 = vshrl.u32 %v1082_v13, 16 }
 0x622   :  { %2782 = vmatpush3.bf16.msra.mxu1 %v1627_v23  ;;  %v1106_v3 = vrot.slane %v1099_v63, %v3590_v7  ;;  %v1132_v44 = vcombine.high %v1131_v2, %v3290_v54  ;;  %v1149_v12 = vshrl.u32 %v1131_v2, 16 }
 0x623   :  { %v1673_v28 = vsel %vm1625_vm3, %v1138_v24, 0  ;;  %2793 = vmatprep.subr.bf16.mxu1 %v3282_v15  ;;  %v1144_v30 = vpack.i.b16 %v1143_v26, %v1142_v21  ;;  %v1719_v33 = vsel %vm1625_vm3, %v1141_v25, 0 }
 0x624   :  { %2788 = vmatpush3.bf16.msra.mxu0 %v1673_v28  ;;  %v1147_v9 = vpack.i.b16 %v1131_v2, %v1106_v3  ;;  %v1148_v20 = vshrl.u32 %v1106_v3, 16 }
 0x625   :  { %2784 = vmatmul.mubr.msk.bf16.vlgmr.msra.gmra.mrb[12].mxu1 %vm1157_vm2, %v1614_v29  ;;  %2799 = vmatprep.subr.bf16.mxu0 %v3282_v15  ;;  %v1765_v55 = vsel %vm1625_vm3, %v1144_v30, 0  ;;  %v1155_v29 = vshrl.u32 %v1132_v44, 16 }
 0x626   :  { %2794 = vmatpush3.bf16.msra.mxu1 %v1719_v33  ;;  %2795 = vmatprep.mubr.msk.bf16.mxu1 %vm3283_vm1, %v3282_v15  ;;  %v1811_v11 = vsel %vm1625_vm3, %v1147_v9, 0  ;;  %v1150_v25 = vpack.i.b16 %v1149_v12, %v1148_v20 }
 0x627   :  { %2790 = vmatmul.mubr.msk.bf16.vlgmr.msra.gmra.mrb[24].mxu0 %vm1157_vm2, %v1615_v34  ;;  %2805 = vmatprep.subr.bf16.mxu1 %v3282_v15 }
 0x628   :  { %2800 = vmatpush3.bf16.msra.mxu0 %v1765_v55  ;;  %2801 = vmatprep.mubr.msk.bf16.mxu0 %vm3283_vm1, %v3282_v15 }
 0x629   :  { %2811 = vmatprep.subr.bf16.mxu0 %v3282_v15 }
 0x635   :  { %v1582_v53 = vpop.xlane.xlu0 %1581 }
 0x636   :  { %2946 = vrcp.f32 %v1582_v53 }
 0x639   :  { %v1588_v61 = vpop.xlane.xlu0 %1587 }
 0x63a   :  { %2948 = vrcp.f32 %v1588_v61 }
 0x63d   :  { %v1591_v0 = vpop.xlane.xlu0 %1590  ;;  %v1585_v1 = vpop.xlane.xlu1 %1584 }
 0x63e   :  { %2950 = vrcp.f32 %v1585_v1 }
 0x640   :  { %v2947_v4 = vpop.eup %2946 }
 0x641   :  { %v1608_v6 = vmul.f32 %v2947_v4, %v3731_v5  ;;  %v1594_v8 = vpop.xlane.xlu0 %1593  ;;  %v1107_v5 = vcombine.high %v1106_v3, %v3290_v54  ;;  %v1597_v14 = vpop.xlane.xlu1 %1596  ;;  %v1857_v54 = vsel %vm1625_vm3, %v1150_v25, 0 }
 0x642   :  { %2952 = vrcp.f32 %v1594_v8 }
 0x643   :  { %2954 = vrcp.f32 %v1591_v0  ;;  %v1616_v10 = vpack.c.bf16 %v1608_v6, %v1608_v6  ;;  %v1153_v23 = vpack.i.b16 %v1132_v44, %v1107_v5  ;;  %v1154_v58 = vshrl.u32 %v1107_v5, 16 }
 0x644   :  { %v2949_v39 = vpop.eup %2948  ;;  %2956 = vrcp.f32 %v1597_v14 }
 0x645   :  { %2796 = vmatmul.mubr.msk.bf16.vlgmr.msra.gmra.mrb[16].mxu1 %vm1157_vm2, %v1616_v10  ;;  %v1610_v13 = vmul.f32 %v2949_v39, %v3735_v16  ;;  %v1903_v16 = vsel %vm1625_vm3, %v1153_v23, 0  ;;  %v1156_v32 = vpack.i.b16 %v1155_v29, %v1154_v58 }
 0x646   :  { %2806 = vmatpush3.bf16.msra.mxu1 %v1811_v11  ;;  %2807 = vmatprep.mubr.msk.bf16.mxu1 %vm3283_vm1, %v3282_v15 }
 0x647   :  { %2817 = vmatprep.subr.bf16.mxu1 %v3282_v15  ;;  %v1618_v26 = vpack.c.bf16 %v1610_v13, %v1610_v13 }
 0x648   :  { %v2951_v21 = vpop.eup %2950 }
 0x649   :  { %v1609_v24 = vmul.f32 %v2951_v21, %v3737_v17 }
 0x64b   :  { %v1617_v56 = vpack.c.bf16 %v1609_v24, %v1609_v24 }
 0x64c   :  { %v2953_v27 = vpop.eup %2952 }
 0x64d   :  { %v2955_v28 = vpop.eup %2954  ;;  %2808 = vmatmul.mubr.msk.bf16.vlgmr.msra.gmra.mrb[20].mxu1 %vm1157_vm2, %v1618_v26  ;;  %2802 = vmatmul.mubr.msk.bf16.vlgmr.msra.gmra.mrb[28].mxu0 %vm1157_vm2, %v1617_v56  ;;  %v1612_v30 = vmul.f32 %v2953_v27, %v3743_v19  ;;  %v1949_v19 = vsel %vm1625_vm3, %v1156_v32, 0 }
 0x64e   :  { %2818 = vmatpush3.bf16.msra.mxu1 %v1903_v16  ;;  %2812 = vmatpush3.bf16.msra.mxu0 %v1857_v54  ;;  %v1611_v17 = vmul.f32 %v2955_v28, %v3741_v18  ;;  %v2957_v35 = vpop.eup %2956 }
 0x64f   :  { %2813 = vmatprep.mubr.msk.bf16.mxu0 %vm3283_vm1, %v3282_v15  ;;  %2819 = vmatprep.mubr.msk.bf16.mxu1 %vm3283_vm1, %v3282_v15  ;;  %v1620_v33 = vpack.c.bf16 %v1612_v30, %v1612_v30  ;;  %v1613_v18 = vmul.f32 %v2957_v35, %v3749_v22 }
 0x650   :  { %2823 = vmatprep.subr.bf16.mxu0 %v3282_v15  ;;  %2829 = vmatprep.subr.bf16.mxu1 %v3282_v15  ;;  %v1619_v34 = vpack.c.bf16 %v1611_v17, %v1611_v17 }
 0x651   :  { %v1621_v36 = vpack.c.bf16 %v1613_v18, %v1613_v18 }
 0x655   :  { %2820 = vmatmul.mubr.msk.bf16.vlgmr.msra.gmra.mrb[24].mxu1 %vm1157_vm2, %v1620_v33  ;;  %2814 = vmatmul.mubr.msk.bf16.vlgmr.msra.gmra.mrb[32].mxu0 %vm1157_vm2, %v1619_v34 }
 0x656   :  { %2833 = vmatprep.mubr.msk.bf16.mxu1 %vm3283_vm1, %v3282_v15  ;;  %2824 = vmatpush3.bf16.msra.mxu0 %v1949_v19 }
 0x657   :  { %2825 = vmatprep.mubr.msk.bf16.mxu0 %vm3283_vm1, %v3282_v15  ;;  %2837 = vmatprep.subr.bf16.mxu0 %v3282_v15 }
 0x65d   :  { %2826 = vmatmul.mubr.msk.bf16.vlgmr.msra.gmra.mrb[36].mxu0 %vm1157_vm2, %v1621_v36 }
 0x65e   :  { %2841 = vmatprep.mubr.msk.bf16.mxu0 %vm3283_vm1, %v3282_v15 }
 0x6f8   :  { %v1663_v55 = vpop.f32.mrb[12].mxu1 }
 0x6f9   :  { %v2785_v31 = vpop.f32.mrb[13].mxu1 }
 0x6fa   :  { %v1666_v37 = vpop.f32.mrb[14].mxu1  ;;  %v1709_v38 = vpop.f32.mrb[24].mxu0 }
 0x6fb   :  { %v2786_v40 = vpop.f32.mrb[15].mxu1  ;;  %v2791_v41 = vpop.f32.mrb[25].mxu0 }
 0x6fc   :  { %v1712_v45 = vpop.f32.mrb[26].mxu0 }
 0x6fd   :  { %v2792_v46 = vpop.f32.mrb[27].mxu0 }
 0x718   :  { %v1755_v47 = vpop.f32.mrb[16].mxu1 }
 0x719   :  { %v1991_v48 = vcombine.low %v1663_v55, %v1755_v47  ;;  %v1992_v49 = vcombine.high %v1663_v55, %v1755_v47  ;;  %v2797_v22 = vpop.f32.mrb[17].mxu1 }
 0x71a   :  { %v1758_v50 = vpop.f32.mrb[18].mxu1 }
 0x71b   :  { %v2798_v51 = vpop.f32.mrb[19].mxu1  ;;  %v1999_v0 = vrot.slane %v1991_v48, %v3585_v60  ;;  %v2006_v1 = vrot.slane %v1992_v49, %v3585_v60 }
 0x720   :  { %v1847_v52 = vpop.f32.mrb[20].mxu1  ;;  %v1801_v53 = vpop.f32.mrb[28].mxu0 }
 0x721   :  { %v2809_v57 = vpop.f32.mrb[21].mxu1  ;;  %v2007_v43 = vcombine.low %v1709_v38, %v1801_v53  ;;  %v2008_v42 = vcombine.high %v1709_v38, %v1801_v53  ;;  %v2803_v59 = vpop.f32.mrb[29].mxu0 }
 0x722   :  { %v1850_v61 = vpop.f32.mrb[22].mxu1  ;;  %v1804_v62 = vpop.f32.mrb[30].mxu0 }
 0x723   :  { %v2810_v63 = vpop.f32.mrb[23].mxu1  ;;  %v2015_v2 = vrot.slane %v2007_v43, %v3585_v60  ;;  %v2022_v3 = vrot.slane %v2008_v42, %v3585_v60  ;;  %v2804_v4 = vpop.f32.mrb[31].mxu0 }
 0x724   :  { %v2910_v4 = vld [vmem:[#allocation10] sm:$0xff]  }
 0x725   :  { %v2023_v6 = vcombine.low %v1999_v0, %v2015_v2  ;;  %v2024_v8 = vcombine.high %v1999_v0, %v2015_v2  ;;  %v2039_v9 = vcombine.low %v2006_v1, %v2022_v3  ;;  %v2040_v10 = vcombine.high %v2006_v1, %v2022_v3  ;;  %2830 = vmatpush3.bf16.msra.mxu1 %v2910_v4  ;;  %v2915_v4 = vld [vmem:[#allocation19 + $0x8] sm:$0xff]  }
 0x726   :  { %2831 = vmatprep.subr.bf16.mxu1 %v3282_v15 }
 0x727   :  { %v2031_v39 = vrot.slane %v2023_v6, %v3590_v7  ;;  %v2038_v11 = vrot.slane %v2024_v8, %v3590_v7  ;;  %v2047_v44 = vrot.slane %v2039_v9, %v3590_v7  ;;  %v2054_v12 = vrot.slane %v2040_v10, %v3590_v7 }
 0x728   :  { %v1939_v13 = vpop.f32.mrb[24].mxu1  ;;  %v1893_v5 = vpop.f32.mrb[32].mxu0 }
 0x729   :  { %v2059_v14 = vcombine.low %v1847_v52, %v1939_v13  ;;  %v2060_v20 = vcombine.high %v1847_v52, %v1939_v13  ;;  %v2821_v21 = vpop.f32.mrb[25].mxu1  ;;  %v2127_v23 = vcombine.low %v2031_v39, %v2038_v11  ;;  %v2652_v24 = vcombine.high %v2031_v39, %v2038_v11  ;;  %v2815_v27 = vpop.f32.mrb[33].mxu0 }
 0x72a   :  { %v2143_v25 = vcombine.low %v2047_v44, %v2054_v12  ;;  %v2653_v26 = vcombine.high %v2047_v44, %v2054_v12  ;;  %v1942_v56 = vpop.f32.mrb[26].mxu1  ;;  %v1896_v28 = vpop.f32.mrb[34].mxu0  ;;  %v2911_v21 = vld [vmem:[#allocation10 + $0x8] sm:$0xff]  }
 0x72b   :  { %v2822_v16 = vpop.f32.mrb[27].mxu1  ;;  %v2134_v54 = vrot.slane %v2127_v23, %v3585_v60  ;;  %v2142_v29 = vrot.slane %v2652_v24, %v3585_v60  ;;  %v2816_v58 = vpop.f32.mrb[35].mxu0  ;;  %v2067_v49 = vrot.slane %v2059_v14, %v3585_v60  ;;  %v2074_v22 = vrot.slane %v2060_v20, %v3585_v60  ;;  %2832 = vmatpush3.bf16.msra.mxu1 %v2911_v21  ;;  %v2660_v21 = vld [vmem:[#allocation13] ss:$0 sm:$0xff] }
 0x72c   :  { %v2150_v30 = vrot.slane %v2143_v25, %v3585_v60  ;;  %v2158_v17 = vrot.slane %v2653_v26, %v3585_v60  ;;  %2845 = vmatprep.subr.bf16.mxu1 %v3282_v15 }
 0x72d   :  { %v2160_v32 = vcombine.high %v2134_v54, %v2142_v29  ;;  %v2159_v34 = vcombine.low %v2134_v54, %v2142_v29 }
 0x72e   :  { %v2176_v33 = vcombine.high %v2150_v30, %v2158_v17  ;;  %v2175_v35 = vcombine.low %v2150_v30, %v2158_v17 }
 0x72f   :  { %v2174_v19 = vrot.slane %v2160_v32, %v3590_v7  ;;  %v3858_v36 = vrot.slane %v2159_v34, %v3590_v7 }
 0x730   :  { %v2190_v18 = vrot.slane %v2176_v33, %v3590_v7  ;;  %v3861_v55 = vrot.slane %v2175_v35, %v3590_v7  ;;  %v1985_v31 = vpop.f32.mrb[36].mxu0 }
 0x731   :  { %v2075_v37 = vcombine.low %v1893_v5, %v1985_v31  ;;  %v2076_v38 = vcombine.high %v1893_v5, %v1985_v31  ;;  %v2827_v40 = vpop.f32.mrb[37].mxu0  ;;  %v2656_v31 = vld [vmem:[#allocation11] ss:$0 sm:$0xff] }
 0x732   :  { %v2193_v41 = vcombine.low %v2174_v19, %v2190_v18  ;;  %v2191_v45 = vcombine.low %v3858_v36, %v3861_v55  ;;  %v1988_v46 = vpop.f32.mrb[38].mxu0  ;;  %v2192_v47 = vcombine.high %v3858_v36, %v3861_v55  ;;  %v2194_v48 = vcombine.high %v2174_v19, %v2190_v18 }
 0x733   :  { %v2083_v50 = vrot.slane %v2075_v37, %v3585_v60  ;;  %v2090_v51 = vrot.slane %v2076_v38, %v3585_v60  ;;  %v2828_v52 = vpop.f32.mrb[39].mxu0 }
 0x735   :  { %v2091_v53 = vcombine.low %v2067_v49, %v2083_v50  ;;  %v2092_v57 = vcombine.high %v2067_v49, %v2083_v50  ;;  %v2107_v43 = vcombine.low %v2074_v22, %v2090_v51  ;;  %v2108_v42 = vcombine.high %v2074_v22, %v2090_v51  ;;  %v2963_v49 = vld [vmem:[#allocation2 + $0x8] sm:$0xff] }
 0x737   :  { %v2099_v59 = vrot.slane %v2091_v53, %v3590_v7  ;;  %v2106_v61 = vrot.slane %v2092_v57, %v3590_v7  ;;  %v2115_v62 = vrot.slane %v2107_v43, %v3590_v7  ;;  %v2122_v63 = vrot.slane %v2108_v42, %v3590_v7 }
 0x739   :  { %v2195_v0 = vcombine.low %v2099_v59, %v2106_v61  ;;  %v2654_v1 = vcombine.high %v2099_v59, %v2106_v61  ;;  %v2211_v2 = vcombine.low %v2115_v62, %v2122_v63  ;;  %v2655_v3 = vcombine.high %v2115_v62, %v2122_v63 }
 0x73b   :  { %v2202_v6 = vrot.slane %v2195_v0, %v3585_v60  ;;  %v2210_v8 = vrot.slane %v2654_v1, %v3585_v60  ;;  %v2218_v9 = vrot.slane %v2211_v2, %v3585_v60  ;;  %v2226_v10 = vrot.slane %v2655_v3, %v3585_v60  ;;  %v2912_v1 = vld [vmem:[#allocation16] sm:$0xff]   ;;  %v2913_v2 = vld [vmem:[#allocation16 + $0x8] sm:$0xff]   ;;  %v2914_v3 = vld [vmem:[#allocation19] sm:$0xff]  }
 0x73c   :  { %2838 = vmatpush3.bf16.msra.mxu0 %v2912_v1 }
 0x73d   :  { %v2228_v39 = vcombine.high %v2202_v6, %v2210_v8  ;;  %v2244_v11 = vcombine.high %v2218_v9, %v2226_v10  ;;  %v2227_v44 = vcombine.low %v2202_v6, %v2210_v8  ;;  %v2243_v12 = vcombine.low %v2218_v9, %v2226_v10  ;;  %2839 = vmatprep.subr.bf16.mxu0 %v3282_v15  ;;  %v2916_v6 = vld [vmem:[#allocation19 + $0x10] sm:$0xff]   ;;  %v2917_v8 = vld [vmem:[#allocation19 + $0x18] sm:$0xff]   ;;  %v2918_v9 = vld [vmem:[#allocation19 + $0x20] sm:$0xff]  }
 0x73e   :  { %v2919_v10 = vld [vmem:[#allocation19 + $0x28] sm:$0xff]  }
 0x73f   :  { %v2242_v13 = vrot.slane %v2228_v39, %v3590_v7  ;;  %v2258_v5 = vrot.slane %v2244_v11, %v3590_v7  ;;  %v2235_v14 = vrot.slane %v2227_v44, %v3590_v7  ;;  %v2251_v20 = vrot.slane %v2243_v12, %v3590_v7 }
 0x740   :  { %2840 = vmatpush3.bf16.msra.mxu0 %v2913_v2 }
 0x741   :  { %v2261_v23 = vcombine.low %v2242_v13, %v2258_v5  ;;  %v2260_v24 = vcombine.high %v2235_v14, %v2251_v20  ;;  %v2259_v25 = vcombine.low %v2235_v14, %v2251_v20  ;;  %v2262_v60 = vcombine.high %v2242_v13, %v2258_v5 }
 0x743   :  { %v2898_v26 = vpack.i.bf16 %v2261_v23, %v2193_v41  ;;  %v2893_v27 = vpack.i.bf16 %v2260_v24, %v2192_v47  ;;  %v2903_v56 = vpack.i.bf16 %v2262_v60, %v2194_v48  ;;  %v2661_v60 = vld [vmem:[#allocation14] ss:$0 sm:$0xff] }
 0x745   :  { %2899 = vrot.lane.b32.xlu1 %v2898_v26, %s3291_s1  ;;  %2894 = vrot.lane.b32.xlu0 %v2893_v27, %s3275_s21 }
 0x749   :  { %2904 = vrot.lane.b32.xlu1 %v2903_v56, %s3292_s19 }
 0x7b7   :  { %v2900_v28 = vpop.permute.xlu1 %2899  ;;  %v2895_v16 = vpop.permute.xlu0 %2894 }
 0x7b8   :  { %v2897_v7 = vunpack.i.h.bf16 %v2895_v16  ;;  %v2896_v54 = vunpack.i.l.bf16 %v2895_v16  ;;  %v2902_v29 = vunpack.i.h.bf16 %v2900_v28  ;;  %v2901_v30 = vunpack.i.l.bf16 %v2900_v28  ;;  %v2920_v16 = vld [vmem:[#allocation19 + $0x30] sm:$0xff]  }
 0x7ba   :  { %v2287_v17 = vsel %vm1157_vm2, %v2191_v45, %v2896_v54  ;;  %v2288_v58 = vsel %vm1157_vm2, %v2259_v25, %v2897_v7  ;;  %v2962_v45 = vld [vmem:[#allocation2] sm:$0xff]  ;;  %v2662_v54 = vld [vmem:[#allocation17] ss:$0 sm:$0xff] }
 0x7bb   :  { %v2905_v32 = vpop.permute.xlu1 %2904  ;;  %v2290_v35 = vsel %vm2289_vm4, %v2287_v17, %v2901_v30  ;;  %v2291_v19 = vsel %vm2289_vm4, %v2288_v58, %v2902_v29  ;;  %v2921_v7 = vld [vmem:[#allocation19 + $0x38] sm:$0xff]  }
 0x7bc   :  { %v2907_v33 = vunpack.i.h.bf16 %v2905_v32  ;;  %v2906_v34 = vunpack.i.l.bf16 %v2905_v32 }
 0x7be   :  { %v2293_v18 = vsel %vm2292_vm5, %v2290_v35, %v2906_v34  ;;  %v2294_v36 = vsel %vm2292_vm5, %v2291_v19, %v2907_v33 }
 0x7bf   :  { %v2295_v55 = vpack.c.bf16 %v2294_v36, %v2293_v18  ;;  %v2666_v18 = vld [vmem:[#allocation20] ss:$0 sm:$0xff] }
 0x7c1   :  { %2834 = vmatmul.mubr.msk.bf16.vlgmr.msra.gmra.mrb[28].mxu1 %vm196_vm0, %v2295_v55 }
 0x7c2   :  { %2861 = vmatprep.mubr.msk.bf16.mxu1 %vm3283_vm1, %v3282_v15  ;;  %2846 = vmatpush3.bf16.msra.mxu1 %v2914_v3 }
 0x7c3   :  { %2847 = vmatprep.subr.bf16.mxu1 %v3282_v15 }
 0x7c6   :  { %2848 = vmatpush3.bf16.msra.mxu1 %v2915_v4 }
 0x7c7   :  { %2849 = vmatprep.subr.bf16.mxu1 %v3282_v15 }
 0x7ca   :  { %2850 = vmatpush3.bf16.msra.mxu1 %v2916_v6 }
 0x7cb   :  { %2851 = vmatprep.subr.bf16.mxu1 %v3282_v15 }
 0x7ce   :  { %2852 = vmatpush3.bf16.msra.mxu1 %v2917_v8 }
 0x7cf   :  { %2853 = vmatprep.subr.bf16.mxu1 %v3282_v15 }
 0x7d2   :  { %2854 = vmatpush3.bf16.msra.mxu1 %v2918_v9 }
 0x7d3   :  { %2855 = vmatprep.subr.bf16.mxu1 %v3282_v15 }
 0x7d6   :  { %2856 = vmatpush3.bf16.msra.mxu1 %v2919_v10 }
 0x7d7   :  { %2857 = vmatprep.subr.bf16.mxu1 %v3282_v15 }
 0x7da   :  { %2858 = vmatpush3.bf16.msra.mxu1 %v2920_v16 }
 0x7db   :  { %2859 = vmatprep.subr.bf16.mxu1 %v3282_v15 }
 0x7de   :  { %2860 = vmatpush3.bf16.msra.mxu1 %v2921_v7 }
 0x894   :  { %v2356_v37 = vpop.f32.mrb[28].mxu1 }
 0x895   :  { %v2357_v38 = vadd.f32 %v2656_v31, %v2356_v37  ;;  %v2835_v40 = vpop.f32.mrb[29].mxu1 }
 0x896   :  { %v2359_v41 = vpop.f32.mrb[30].mxu1 }
 0x897   :  { %v3891_v46 = vadd.f32 %v2962_v45, %v2357_v38  ;;  %v2360_v47 = vadd.f32 %v2656_v31, %v2359_v41  ;;  %v2836_v48 = vpop.f32.mrb[31].mxu1 }
 0x899   :  { %v3893_v22 = vadd.f32 %v2963_v49, %v2360_v47  ;;  %v2367_v50 = vsel %vm196_vm0, %v3891_v46, 0.0 }
 0x89a   :  { %2368 = vadd.xlane.f32.xlu1 %v2367_v50 }
 0x89b   :  { %v2370_v51 = vsel %vm196_vm0, %v3893_v22, 0.0 }
 0x89c   :  { %2371 = vadd.xlane.f32.xlu0 %v2370_v51 }
 0x927   :  { %v2369_v52 = vpop.xlane.xlu1 %2368 }
 0x928   :  { %v2373_v53 = vmul.f32 0.03125, %v2369_v52 }
 0x929   :  { %v2372_v57 = vpop.xlane.xlu0 %2371 }
 0x92a   :  { %v2375_v43 = vsub.f32 %v3891_v46, %v2373_v53  ;;  %v2374_v42 = vmul.f32 0.03125, %v2372_v57 }
 0x92c   :  { %v2376_v59 = vsub.f32 %v3893_v22, %v2374_v42  ;;  %v2377_v61 = vmul.f32 %v2375_v43, %v2375_v43 }
 0x92e   :  { %v2379_v62 = vsel %vm196_vm0, %v2377_v61, 0.0  ;;  %v2378_v63 = vmul.f32 %v2376_v59, %v2376_v59 }
 0x92f   :  { %2380 = vadd.xlane.f32.xlu0 %v2379_v62 }
 0x930   :  { %v2382_v0 = vsel %vm196_vm0, %v2378_v63, 0.0 }
 0x933   :  { %2383 = vadd.xlane.f32.xlu0 %v2382_v0 }
 0x9bc   :  { %v2381_v39 = vpop.xlane.xlu0 %2380 }
 0x9bd   :  { %v2385_v11 = vmul.f32 0.03125, %v2381_v39 }
 0x9bf   :  { %v2387_v44 = vadd.f32 1e-05, %v2385_v11 }
 0x9c0   :  { %v2384_v12 = vpop.xlane.xlu0 %2383 }
 0x9c1   :  { %2958 = vrsqrt.f32 %v2387_v44  ;;  %v2386_v13 = vmul.f32 0.03125, %v2384_v12 }
 0x9c3   :  { %v2388_v5 = vadd.f32 1e-05, %v2386_v13 }
 0x9c5   :  { %2960 = vrsqrt.f32 %v2388_v5 }
 0x9cb   :  { %v2959_v14 = vpop.eup %2958 }
 0x9cc   :  { %v2391_v20 = vmul.f32 %v2959_v14, %v2375_v43 }
 0x9ce   :  { %v2399_v24 = vmul.f32 %v2660_v21, %v2391_v20 }
 0x9cf   :  { %v2961_v23 = vpop.eup %2960 }
 0x9d0   :  { %v2392_v25 = vmul.f32 %v2961_v23, %v2376_v59  ;;  %v2407_v27 = vadd.f32 %v2661_v60, %v2399_v24 }
 0x9d2   :  { %v2400_v26 = vmul.f32 %v2660_v21, %v2392_v25 }
 0x9d4   :  { %v2408_v56 = vadd.f32 %v2661_v60, %v2400_v26 }
 0x9d6   :  { %v2409_v28 = vpack.c.bf16 %v2408_v56, %v2407_v27 }
 0x9d8   :  { %2842 = vmatmul.mubr.msk.bf16.vlgmr.msra.gmra.mrb[40].mxu0 %vm196_vm0, %v2409_v28 }
 0xaab   :  { %v2470_v29 = vpop.f32.mrb[40].mxu0 }
 0xaac   :  { %v2471_v30 = vadd.f32 %v2662_v54, %v2470_v29  ;;  %v2843_v17 = vpop.f32.mrb[41].mxu0 }
 0xaad   :  { %v2473_v58 = vpop.f32.mrb[42].mxu0 }
 0xaae   :  { %v2474_v32 = vadd.f32 %v2662_v54, %v2473_v58  ;;  %v2844_v33 = vpop.f32.mrb[43].mxu0  ;;  %v2477_v34 = vmax.f32 %v2471_v30, 0.0 }
 0xab0   :  { %v2478_v35 = vmax.f32 %v2474_v32, 0.0 }
 0xab2   :  { %v2479_v19 = vpack.c.bf16 %v2478_v35, %v2477_v34 }
 0xab4   :  { %2862 = vmatmul.mubr.bf16.vlgmr.msra.gmra.mrb[32].mxu1 %v2479_v19 }
 0xb87   :  { %v2585_v36 = vpop.f32.mrb[32].mxu1 }
 0xb88   :  { %v2586_v55 = vadd.f32 %v2666_v18, %v2585_v36  ;;  %v2863_v31 = vpop.f32.mrb[33].mxu1 }
 0xb89   :  { %v2588_v37 = vpop.f32.mrb[34].mxu1 }
 0xb8a   :  { %v2592_v15 = vadd.f32 %v2586_v55, %v3891_v46  ;;  %v2589_v38 = vadd.f32 %v2666_v18, %v2588_v37  ;;  %v2864_v40 = vpop.f32.mrb[35].mxu1 }
 0xb8c   :  { %2594 = vst.msk [vmem:[#allocation22] sm:$0xff] %vm196_vm0, %v2592_v15  ;;  %v2593_v41 = vadd.f32 %v2589_v38, %v3893_v22 }
 0xb8e   :  { %2595 = vst.msk [vmem:[#allocation22 + $0x8] sm:$0xff] %vm196_vm0, %v2593_v41 }
 0xb8f   :  { %3239 = shalt.err (!%p3236_p2)
}
 0xb90   :  { %s3240_s4 = scalar_lea.hbm %s3943_s12, 256 }
 0xb91   :  { %p3241_p3 = scmp.ne.s32.totalorder %s3943_s12, %s3240_s4  ;;  %p3244_p4 = scmp.lt.u32.totalorder %s3240_s4, %s3943_s12 }
 0xb93   :  { %p3246_p5 = pnand %p3244_p4, %p3241_p3 }
 0xb95   :  { %3249 = shalt.err (!%p3246_p5)
}
 0xb96   :  { %2607 = dma.vmem_to_hbm [thread:$0]  %s2602_s3, 256, %s3943_s12, [#allocation4], %s3274_s9, %s3274_s9, %s3275_s21  }
 0xb97   :  { %3264 = dma.done.wait [#allocation4], 256  }
 0xb98   :  { %3265 = vsyncadd [#allocation4], 4294967040 }
 0xb99   :  { %2611 = vsyncpa [#allocation3], 1 }
 0xb9a   :  { %2612 = vsyncpa [#allocation6], 1 }
 0xb9b   :  { %2613 = vsyncpa [#allocation9], 1 }
 0xb9c   :  { %2614 = vsyncpa [#allocation12], 1 }
 0xb9d   :  { %2615 = vsyncpa [#allocation15], 1 }
 0xb9e   :  { %2616 = vsyncpa [#allocation18], 1 }
 0xb9f   :  { %2617 = vsyncpa [#allocation21], 1 }
 0xba0   :  { %2618 = vsyncpa [#allocation4], 1 }

</bundles_post_ra>
